<compile_context>
chip_gen: v7x
topology: tpu7x:2x2x1
jax: 0.10.0
libtpu: 0.0.40
codegen_flags: <defaults>
</compile_context>

<pallas_src>
import jax
import jax.numpy as jnp
from jax.experimental import pallas as pl
from jax.experimental.pallas import tpu as pltpu

EPS = 1e-5  # torch.nn.LayerNorm default


def _layernorm(y, gamma, beta):
    # One-pass stats: sum(y) and sum(y*y) have no dependency chain, so both
    # cross-lane reductions can issue concurrently on the XLU units.
    mean = jnp.mean(y, axis=-1, keepdims=True)
    mean_sq = jnp.mean(y * y, axis=-1, keepdims=True)
    var = mean_sq - mean * mean
    return (y - mean) * jax.lax.rsqrt(var + EPS) * gamma + beta


def _lin_ln_relu(h_bf16, w_bf16, gamma, beta):
    # Linear(bias=False) -> LayerNorm -> ReLU.
    # bf16 operands on the MXU, f32 accumulation and f32 LayerNorm stats,
    # single bf16 cast after the ReLU.
    y = jnp.dot(h_bf16, w_bf16, preferred_element_type=jnp.float32)
    return jnp.maximum(_layernorm(y, gamma, beta), 0.0).astype(jnp.bfloat16)


def _make_kernel(split_decoder_dots):
    def skipblock_kernel(x_ref,
                         we1_ref, ge1_ref, be1_ref,      # encoder block 1
                         we2_ref, ge2_ref, be2_ref,      # encoder block 2
                         wb_ref, gb_ref, bb_ref,         # bottleneck
                         wd1_ref, gd1_ref, bd1_ref,      # decoder block 1 (cat input)
                         wd2_ref, gd2_ref, bd2_ref,      # decoder block 2 (cat input)
                         o_ref):
        x = x_ref[...]                                   # bf16, fed straight to MXU

        # ---- encoder: skips stay VMEM/vreg resident (bf16) for this row tile ----
        s1 = _lin_ln_relu(x, we1_ref[...], ge1_ref[...], be1_ref[...])
        s2 = _lin_ln_relu(s1, we2_ref[...], ge2_ref[...], be2_ref[...])

        # ---- bottleneck ----
        h = _lin_ln_relu(s2, wb_ref[...], gb_ref[...], bb_ref[...])

        # ---- decoder: torch.cat([h, skip], dim=1) -> Linear -> LN -> ReLU ----
        def cat_block(h_b, skip_b, w_ref, g_ref, b_ref):
            if split_decoder_dots:
                # v5e-friendly: two K=128 dots, no materialized concat.
                d = h_b.shape[-1]
                w = w_ref[...]
                y = (jnp.dot(h_b, w[:d, :], preferred_element_type=jnp.float32)
                     + jnp.dot(skip_b, w[d:, :], preferred_element_type=jnp.float32))
            else:
                # v6e/v7x: one lane-contiguous concat + single K=256 dot
                # (fills the 256-deep MXU, halves vmatmul pushes / result pops).
                hs = jnp.concatenate([h_b, skip_b], axis=-1)
                y = jnp.dot(hs, w_ref[...], preferred_element_type=jnp.float32)
            return jnp.maximum(_layernorm(y, g_ref[...], b_ref[...]),
                               0.0).astype(jnp.bfloat16)

        h = cat_block(h, s2, wd1_ref, gd1_ref, bd1_ref)   # pops s2 first (LIFO)
        h = cat_block(h, s1, wd2_ref, gd2_ref, bd2_ref)   # then s1

        o_ref[...] = h.astype(o_ref.dtype)

    return skipblock_kernel


def _round_up(a, m):
    return (a + m - 1) // m * m


def skipblock_forward(x,
                      we1, ge1, be1, we2, ge2, be2,
                      wb, gb, bb,
                      wd1, gd1, bd1, wd2, gd2, bd2,
                      *, tile_b=4096, split_decoder_dots=False):
    """x: [B, F] bf16; weights bf16 stored [in, out]; LN params f32 [1, F]."""
    B, F_in = x.shape
    F_out = wd2.shape[1]

    # bf16 packs [16,128] per vreg -> keep tiles/padding 16-row aligned.
    b16 = _round_up(B, 16)
    tile = min(_round_up(tile_b, 16), b16)
    # Guarantee >= 2 grid steps when the batch allows it so the "parallel"
    # batch axis can shard across both v7x TensorCores (no-op on v5e/v6e).
    if b16 >= 32:
        tile = min(tile, _round_up(-(-b16 // 2), 16))

    pad_b = _round_up(B, tile)
    if pad_b != B:
        x = jnp.pad(x, ((0, pad_b - B), (0, 0)))
    grid = (pad_b // tile,)

    full = lambda i: (0, 0)          # weights/LN params resident across all tiles
    resident = lambda a: pl.BlockSpec(a.shape, full)

    out = pl.pallas_call(
        _make_kernel(split_decoder_dots),
        out_shape=jax.ShapeDtypeStruct((pad_b, F_out), jnp.bfloat16),
        grid_spec=pltpu.PrefetchScalarGridSpec(
            num_scalar_prefetch=0,
            grid=grid,
            in_specs=[
                pl.BlockSpec((tile, F_in), lambda i: (i, 0)),     # x row tile
                resident(we1), resident(ge1), resident(be1),
                resident(we2), resident(ge2), resident(be2),
                resident(wb), resident(gb), resident(bb),
                resident(wd1), resident(gd1), resident(bd1),
                resident(wd2), resident(gd2), resident(bd2),
            ],
            out_specs=pl.BlockSpec((tile, F_out), lambda i: (i, 0)),
        ),
        compiler_params=pltpu.CompilerParams(
            dimension_semantics=("parallel",),
            vmem_limit_bytes=32 * 1024 * 1024,   # headroom for tile_b up to 4096
        ),
    )(x, we1, ge1, be1, we2, ge2, be2, wb, gb, bb,
      wd1, gd1, bd1, wd2, gd2, bd2)
    return out[:B]


def reference_forward(x,
                      we1, ge1, be1, we2, ge2, be2,
                      wb, gb, bb,
                      wd1, gd1, bd1, wd2, gd2, bd2):
    """Pure-JAX mirror of SkipBlock.forward (two-pass LayerNorm, like torch)."""
    def layernorm(h, g, b):
        mean = jnp.mean(h, axis=-1, keepdims=True)
        var = jnp.mean(jnp.square(h - mean), axis=-1, keepdims=True)
        return (h - mean) * jax.lax.rsqrt(var + EPS) * g + b

    def block(h, w, g, b):
        y = jnp.dot(h.astype(jnp.bfloat16), w, preferred_element_type=jnp.float32)
        return jnp.maximum(layernorm(y, g, b), 0.0)

    h = x.astype(jnp.float32)
    skips = []
    for w, g, b in ((we1, ge1, be1), (we2, ge2, be2)):      # encoder
        h = block(h, w, g, b)
        skips.append(h)
    h = block(h, wb, gb, bb)                                 # bottleneck
    for w, g, b in ((wd1, gd1, bd1), (wd2, gd2, bd2)):       # decoder
        h = block(jnp.concatenate([h, skips.pop()], axis=1), w, g, b)
    return h.astype(jnp.bfloat16)


if __name__ == "__main__":
    F = 128          # lane-dense feature width for every stage
    B = 50           # deliberately not a multiple of 16 -> exercises padding

    key = jax.random.PRNGKey(0)
    kx, k1, k2, k3, k4, k5 = jax.random.split(key, 6)

    def lin_w(k, fin, fout):
        bound = 1.0 / jnp.sqrt(fin)
        return jax.random.uniform(k, (fin, fout), jnp.float32,
                                  -bound, bound).astype(jnp.bfloat16)

    x = jax.random.normal(kx, (B, F), jnp.float32).astype(jnp.bfloat16)

    we1 = lin_w(k1, F, F)
    we2 = lin_w(k2, F, F)
    wb = lin_w(k3, F, F)
    wd1 = lin_w(k4, 2 * F, F)      # decoder sees cat([x, skip]) -> 2F inputs
    wd2 = lin_w(k5, 2 * F, F)

    ones = jnp.ones((1, F), jnp.float32)     # LayerNorm weight init (torch: 1)
    zeros = jnp.zeros((1, F), jnp.float32)   # LayerNorm bias init   (torch: 0)
    params = (we1, ones, zeros, we2, ones, zeros,
              wb, ones, zeros,
              wd1, ones, zeros, wd2, ones, zeros)

    # Small batch: padded 50 -> 64 rows, split into 2 tiles (v7x megacore path).
    out = jax.block_until_ready(skipblock_forward(x, *params))
    ref = reference_forward(x, *params)
    assert out.shape == (B, F)
    assert jnp.allclose(out.astype(jnp.float32), ref.astype(jnp.float32),
                        atol=5e-2, rtol=5e-2)

    # Multi-tile path with a small explicit tile (several grid steps).
    B2 = 272
    x2 = jax.random.normal(jax.random.PRNGKey(1), (B2, F),
                           jnp.float32).astype(jnp.bfloat16)
    out2 = jax.block_until_ready(skipblock_forward(x2, *params, tile_b=64))
    ref2 = reference_forward(x2, *params)
    assert out2.shape == (B2, F)
    assert jnp.allclose(out2.astype(jnp.float32), ref2.astype(jnp.float32),
                        atol=5e-2, rtol=5e-2)

    # Split-dot decoder variant (preferred on v5e's 128x128 MXU).
    out3 = jax.block_until_ready(
        skipblock_forward(x, *params, split_decoder_dots=True))
    assert jnp.allclose(out3.astype(jnp.float32), ref.astype(jnp.float32),
                        atol=5e-2, rtol=5e-2)

    print("KERNEL_OK")
</pallas_src>

<mosaic_0001>
module attributes {stable_mosaic.version = 11 : i64} {
  func.func @skipblock_kernel(%arg0: i32, %arg1: memref<32x128xbf16, #tpu.memory_space<vmem>>, %arg2: memref<128x128xbf16, #tpu.memory_space<vmem>>, %arg3: memref<1x128xf32, #tpu.memory_space<vmem>>, %arg4: memref<1x128xf32, #tpu.memory_space<vmem>>, %arg5: memref<128x128xbf16, #tpu.memory_space<vmem>>, %arg6: memref<1x128xf32, #tpu.memory_space<vmem>>, %arg7: memref<1x128xf32, #tpu.memory_space<vmem>>, %arg8: memref<128x128xbf16, #tpu.memory_space<vmem>>, %arg9: memref<1x128xf32, #tpu.memory_space<vmem>>, %arg10: memref<1x128xf32, #tpu.memory_space<vmem>>, %arg11: memref<256x128xbf16, #tpu.memory_space<vmem>>, %arg12: memref<1x128xf32, #tpu.memory_space<vmem>>, %arg13: memref<1x128xf32, #tpu.memory_space<vmem>>, %arg14: memref<256x128xbf16, #tpu.memory_space<vmem>>, %arg15: memref<1x128xf32, #tpu.memory_space<vmem>>, %arg16: memref<1x128xf32, #tpu.memory_space<vmem>>, %arg17: memref<32x128xbf16, #tpu.memory_space<vmem>>) attributes {dimension_semantics = [#tpu.dimension_semantics<parallel>], iteration_bounds = array<i64: 2>, scalar_prefetch = 0 : i64, scratch_operands = 0 : i64, tpu.core_type = #tpu.core_type<tc>, window_params = [{transform_indices = @transform_0, window_bounds = array<i64: 32, 128>}, {pipeline_mode = #tpu.pipeline_mode<synchronous>, transform_indices = @transform_1, window_bounds = array<i64: 128, 128>}, {pipeline_mode = #tpu.pipeline_mode<synchronous>, transform_indices = @transform_2, window_bounds = array<i64: 1, 128>}, {pipeline_mode = #tpu.pipeline_mode<synchronous>, transform_indices = @transform_3, window_bounds = array<i64: 1, 128>}, {pipeline_mode = #tpu.pipeline_mode<synchronous>, transform_indices = @transform_4, window_bounds = array<i64: 128, 128>}, {pipeline_mode = #tpu.pipeline_mode<synchronous>, transform_indices = @transform_5, window_bounds = array<i64: 1, 128>}, {pipeline_mode = #tpu.pipeline_mode<synchronous>, transform_indices = @transform_6, window_bounds = array<i64: 1, 128>}, {pipeline_mode = #tpu.pipeline_mode<synchronous>, transform_indices = @transform_7, window_bounds = array<i64: 128, 128>}, {pipeline_mode = #tpu.pipeline_mode<synchronous>, transform_indices = @transform_8, window_bounds = array<i64: 1, 128>}, {pipeline_mode = #tpu.pipeline_mode<synchronous>, transform_indices = @transform_9, window_bounds = array<i64: 1, 128>}, {pipeline_mode = #tpu.pipeline_mode<synchronous>, transform_indices = @transform_10, window_bounds = array<i64: 256, 128>}, {pipeline_mode = #tpu.pipeline_mode<synchronous>, transform_indices = @transform_11, window_bounds = array<i64: 1, 128>}, {pipeline_mode = #tpu.pipeline_mode<synchronous>, transform_indices = @transform_12, window_bounds = array<i64: 1, 128>}, {pipeline_mode = #tpu.pipeline_mode<synchronous>, transform_indices = @transform_13, window_bounds = array<i64: 256, 128>}, {pipeline_mode = #tpu.pipeline_mode<synchronous>, transform_indices = @transform_14, window_bounds = array<i64: 1, 128>}, {pipeline_mode = #tpu.pipeline_mode<synchronous>, transform_indices = @transform_15, window_bounds = array<i64: 1, 128>}, {transform_indices = @transform_16, window_bounds = array<i64: 32, 128>}]} {
    %c0 = arith.constant 0 : index
    %c0_0 = arith.constant 0 : index
    %0 = vector.load %arg1[%c0, %c0_0] : memref<32x128xbf16, #tpu.memory_space<vmem>>, vector<32x128xbf16>
    %c0_1 = arith.constant 0 : index
    %c0_2 = arith.constant 0 : index
    %1 = vector.load %arg2[%c0_1, %c0_2] : memref<128x128xbf16, #tpu.memory_space<vmem>>, vector<128x128xbf16>
    %c0_3 = arith.constant 0 : index
    %c0_4 = arith.constant 0 : index
    %2 = vector.load %arg3[%c0_3, %c0_4] : memref<1x128xf32, #tpu.memory_space<vmem>>, vector<1x128xf32>
    %c0_5 = arith.constant 0 : index
    %c0_6 = arith.constant 0 : index
    %3 = vector.load %arg4[%c0_5, %c0_6] : memref<1x128xf32, #tpu.memory_space<vmem>>, vector<1x128xf32>
    %cst = arith.constant dense<0.000000e+00> : vector<32x128xf32>
    %4 = tpu.matmul %0, %1, %cst {dimension_numbers = #tpu.dot_dimension_numbers<[1], [0], [0], [1], [0, 0, 1, 1], [], []>} : vector<32x128xbf16>, vector<128x128xbf16>, vector<32x128xf32> -> vector<32x128xf32>
    %cst_7 = arith.constant dense<0.000000e+00> : vector<32xf32>
    %5 = vector.multi_reduction <add>, %4, %cst_7 [1] : vector<32x128xf32> to vector<32xf32>
    %6 = vector.shape_cast %5 : vector<32xf32> to vector<32x1xf32>
    %cst_8 = arith.constant 1.280000e+02 : f32
    %7 = vector.broadcast %cst_8 : f32 to vector<32x1xf32>
    %8 = arith.divf %6, %7 : vector<32x1xf32>
    %9 = arith.mulf %4, %4 : vector<32x128xf32>
    %cst_9 = arith.constant dense<0.000000e+00> : vector<32xf32>
    %10 = vector.multi_reduction <add>, %9, %cst_9 [1] : vector<32x128xf32> to vector<32xf32>
    %11 = vector.shape_cast %10 : vector<32xf32> to vector<32x1xf32>
    %cst_10 = arith.constant 1.280000e+02 : f32
    %12 = vector.broadcast %cst_10 : f32 to vector<32x1xf32>
    %13 = arith.divf %11, %12 : vector<32x1xf32>
    %14 = arith.mulf %8, %8 : vector<32x1xf32>
    %15 = arith.subf %13, %14 : vector<32x1xf32>
    %16 = vector.broadcast %8 : vector<32x1xf32> to vector<32x128xf32>
    %17 = arith.subf %4, %16 : vector<32x128xf32>
    %cst_11 = arith.constant 9.99999974E-6 : f32
    %18 = vector.broadcast %cst_11 : f32 to vector<32x1xf32>
    %19 = arith.addf %15, %18 : vector<32x1xf32>
    %20 = math.rsqrt %19 : vector<32x1xf32>
    %21 = vector.broadcast %20 : vector<32x1xf32> to vector<32x128xf32>
    %22 = arith.mulf %17, %21 : vector<32x128xf32>
    %23 = vector.broadcast %2 : vector<1x128xf32> to vector<32x128xf32>
    %24 = arith.mulf %22, %23 : vector<32x128xf32>
    %25 = vector.broadcast %3 : vector<1x128xf32> to vector<32x128xf32>
    %26 = arith.addf %24, %25 : vector<32x128xf32>
    %cst_12 = arith.constant 0.000000e+00 : f32
    %27 = vector.broadcast %cst_12 : f32 to vector<32x128xf32>
    %28 = arith.maximumf %26, %27 : vector<32x128xf32>
    %29 = arith.truncf %28 : vector<32x128xf32> to vector<32x128xbf16>
    %c0_13 = arith.constant 0 : index
    %c0_14 = arith.constant 0 : index
    %30 = vector.load %arg5[%c0_13, %c0_14] : memref<128x128xbf16, #tpu.memory_space<vmem>>, vector<128x128xbf16>
    %c0_15 = arith.constant 0 : index
    %c0_16 = arith.constant 0 : index
    %31 = vector.load %arg6[%c0_15, %c0_16] : memref<1x128xf32, #tpu.memory_space<vmem>>, vector<1x128xf32>
    %c0_17 = arith.constant 0 : index
    %c0_18 = arith.constant 0 : index
    %32 = vector.load %arg7[%c0_17, %c0_18] : memref<1x128xf32, #tpu.memory_space<vmem>>, vector<1x128xf32>
    %cst_19 = arith.constant dense<0.000000e+00> : vector<32x128xf32>
    %33 = tpu.matmul %29, %30, %cst_19 {dimension_numbers = #tpu.dot_dimension_numbers<[1], [0], [0], [1], [0, 0, 1, 1], [], []>} : vector<32x128xbf16>, vector<128x128xbf16>, vector<32x128xf32> -> vector<32x128xf32>
    %cst_20 = arith.constant dense<0.000000e+00> : vector<32xf32>
    %34 = vector.multi_reduction <add>, %33, %cst_20 [1] : vector<32x128xf32> to vector<32xf32>
    %35 = vector.shape_cast %34 : vector<32xf32> to vector<32x1xf32>
    %cst_21 = arith.constant 1.280000e+02 : f32
    %36 = vector.broadcast %cst_21 : f32 to vector<32x1xf32>
    %37 = arith.divf %35, %36 : vector<32x1xf32>
    %38 = arith.mulf %33, %33 : vector<32x128xf32>
    %cst_22 = arith.constant dense<0.000000e+00> : vector<32xf32>
    %39 = vector.multi_reduction <add>, %38, %cst_22 [1] : vector<32x128xf32> to vector<32xf32>
    %40 = vector.shape_cast %39 : vector<32xf32> to vector<32x1xf32>
    %cst_23 = arith.constant 1.280000e+02 : f32
    %41 = vector.broadcast %cst_23 : f32 to vector<32x1xf32>
    %42 = arith.divf %40, %41 : vector<32x1xf32>
    %43 = arith.mulf %37, %37 : vector<32x1xf32>
    %44 = arith.subf %42, %43 : vector<32x1xf32>
    %45 = vector.broadcast %37 : vector<32x1xf32> to vector<32x128xf32>
    %46 = arith.subf %33, %45 : vector<32x128xf32>
    %cst_24 = arith.constant 9.99999974E-6 : f32
    %47 = vector.broadcast %cst_24 : f32 to vector<32x1xf32>
    %48 = arith.addf %44, %47 : vector<32x1xf32>
    %49 = math.rsqrt %48 : vector<32x1xf32>
    %50 = vector.broadcast %49 : vector<32x1xf32> to vector<32x128xf32>
    %51 = arith.mulf %46, %50 : vector<32x128xf32>
    %52 = vector.broadcast %31 : vector<1x128xf32> to vector<32x128xf32>
    %53 = arith.mulf %51, %52 : vector<32x128xf32>
    %54 = vector.broadcast %32 : vector<1x128xf32> to vector<32x128xf32>
    %55 = arith.addf %53, %54 : vector<32x128xf32>
    %cst_25 = arith.constant 0.000000e+00 : f32
    %56 = vector.broadcast %cst_25 : f32 to vector<32x128xf32>
    %57 = arith.maximumf %55, %56 : vector<32x128xf32>
    %58 = arith.truncf %57 : vector<32x128xf32> to vector<32x128xbf16>
    %c0_26 = arith.constant 0 : index
    %c0_27 = arith.constant 0 : index
    %59 = vector.load %arg8[%c0_26, %c0_27] : memref<128x128xbf16, #tpu.memory_space<vmem>>, vector<128x128xbf16>
    %c0_28 = arith.constant 0 : index
    %c0_29 = arith.constant 0 : index
    %60 = vector.load %arg9[%c0_28, %c0_29] : memref<1x128xf32, #tpu.memory_space<vmem>>, vector<1x128xf32>
    %c0_30 = arith.constant 0 : index
    %c0_31 = arith.constant 0 : index
    %61 = vector.load %arg10[%c0_30, %c0_31] : memref<1x128xf32, #tpu.memory_space<vmem>>, vector<1x128xf32>
    %cst_32 = arith.constant dense<0.000000e+00> : vector<32x128xf32>
    %62 = tpu.matmul %58, %59, %cst_32 {dimension_numbers = #tpu.dot_dimension_numbers<[1], [0], [0], [1], [0, 0, 1, 1], [], []>} : vector<32x128xbf16>, vector<128x128xbf16>, vector<32x128xf32> -> vector<32x128xf32>
    %cst_33 = arith.constant dense<0.000000e+00> : vector<32xf32>
    %63 = vector.multi_reduction <add>, %62, %cst_33 [1] : vector<32x128xf32> to vector<32xf32>
    %64 = vector.shape_cast %63 : vector<32xf32> to vector<32x1xf32>
    %cst_34 = arith.constant 1.280000e+02 : f32
    %65 = vector.broadcast %cst_34 : f32 to vector<32x1xf32>
    %66 = arith.divf %64, %65 : vector<32x1xf32>
    %67 = arith.mulf %62, %62 : vector<32x128xf32>
    %cst_35 = arith.constant dense<0.000000e+00> : vector<32xf32>
    %68 = vector.multi_reduction <add>, %67, %cst_35 [1] : vector<32x128xf32> to vector<32xf32>
    %69 = vector.shape_cast %68 : vector<32xf32> to vector<32x1xf32>
    %cst_36 = arith.constant 1.280000e+02 : f32
    %70 = vector.broadcast %cst_36 : f32 to vector<32x1xf32>
    %71 = arith.divf %69, %70 : vector<32x1xf32>
    %72 = arith.mulf %66, %66 : vector<32x1xf32>
    %73 = arith.subf %71, %72 : vector<32x1xf32>
    %74 = vector.broadcast %66 : vector<32x1xf32> to vector<32x128xf32>
    %75 = arith.subf %62, %74 : vector<32x128xf32>
    %cst_37 = arith.constant 9.99999974E-6 : f32
    %76 = vector.broadcast %cst_37 : f32 to vector<32x1xf32>
    %77 = arith.addf %73, %76 : vector<32x1xf32>
    %78 = math.rsqrt %77 : vector<32x1xf32>
    %79 = vector.broadcast %78 : vector<32x1xf32> to vector<32x128xf32>
    %80 = arith.mulf %75, %79 : vector<32x128xf32>
    %81 = vector.broadcast %60 : vector<1x128xf32> to vector<32x128xf32>
    %82 = arith.mulf %80, %81 : vector<32x128xf32>
    %83 = vector.broadcast %61 : vector<1x128xf32> to vector<32x128xf32>
    %84 = arith.addf %82, %83 : vector<32x128xf32>
    %cst_38 = arith.constant 0.000000e+00 : f32
    %85 = vector.broadcast %cst_38 : f32 to vector<32x128xf32>
    %86 = arith.maximumf %84, %85 : vector<32x128xf32>
    %87 = arith.truncf %86 : vector<32x128xf32> to vector<32x128xbf16>
    %88 = tpu.concatenate %87, %58 in 1 : vector<32x128xbf16>, vector<32x128xbf16> -> vector<32x256xbf16>
    %c0_39 = arith.constant 0 : index
    %c0_40 = arith.constant 0 : index
    %89 = vector.load %arg11[%c0_39, %c0_40] : memref<256x128xbf16, #tpu.memory_space<vmem>>, vector<256x128xbf16>
    %cst_41 = arith.constant dense<0.000000e+00> : vector<32x128xf32>
    %90 = tpu.matmul %88, %89, %cst_41 {dimension_numbers = #tpu.dot_dimension_numbers<[1], [0], [0], [1], [0, 0, 1, 1], [], []>} : vector<32x256xbf16>, vector<256x128xbf16>, vector<32x128xf32> -> vector<32x128xf32>
    %c0_42 = arith.constant 0 : index
    %c0_43 = arith.constant 0 : index
    %91 = vector.load %arg12[%c0_42, %c0_43] : memref<1x128xf32, #tpu.memory_space<vmem>>, vector<1x128xf32>
    %c0_44 = arith.constant 0 : index
    %c0_45 = arith.constant 0 : index
    %92 = vector.load %arg13[%c0_44, %c0_45] : memref<1x128xf32, #tpu.memory_space<vmem>>, vector<1x128xf32>
    %cst_46 = arith.constant dense<0.000000e+00> : vector<32xf32>
    %93 = vector.multi_reduction <add>, %90, %cst_46 [1] : vector<32x128xf32> to vector<32xf32>
    %94 = vector.shape_cast %93 : vector<32xf32> to vector<32x1xf32>
    %cst_47 = arith.constant 1.280000e+02 : f32
    %95 = vector.broadcast %cst_47 : f32 to vector<32x1xf32>
    %96 = arith.divf %94, %95 : vector<32x1xf32>
    %97 = arith.mulf %90, %90 : vector<32x128xf32>
    %cst_48 = arith.constant dense<0.000000e+00> : vector<32xf32>
    %98 = vector.multi_reduction <add>, %97, %cst_48 [1] : vector<32x128xf32> to vector<32xf32>
    %99 = vector.shape_cast %98 : vector<32xf32> to vector<32x1xf32>
    %cst_49 = arith.constant 1.280000e+02 : f32
    %100 = vector.broadcast %cst_49 : f32 to vector<32x1xf32>
    %101 = arith.divf %99, %100 : vector<32x1xf32>
    %102 = arith.mulf %96, %96 : vector<32x1xf32>
    %103 = arith.subf %101, %102 : vector<32x1xf32>
    %104 = vector.broadcast %96 : vector<32x1xf32> to vector<32x128xf32>
    %105 = arith.subf %90, %104 : vector<32x128xf32>
    %cst_50 = arith.constant 9.99999974E-6 : f32
    %106 = vector.broadcast %cst_50 : f32 to vector<32x1xf32>
    %107 = arith.addf %103, %106 : vector<32x1xf32>
    %108 = math.rsqrt %107 : vector<32x1xf32>
    %109 = vector.broadcast %108 : vector<32x1xf32> to vector<32x128xf32>
    %110 = arith.mulf %105, %109 : vector<32x128xf32>
    %111 = vector.broadcast %91 : vector<1x128xf32> to vector<32x128xf32>
    %112 = arith.mulf %110, %111 : vector<32x128xf32>
    %113 = vector.broadcast %92 : vector<1x128xf32> to vector<32x128xf32>
    %114 = arith.addf %112, %113 : vector<32x128xf32>
    %cst_51 = arith.constant 0.000000e+00 : f32
    %115 = vector.broadcast %cst_51 : f32 to vector<32x128xf32>
    %116 = arith.maximumf %114, %115 : vector<32x128xf32>
    %117 = arith.truncf %116 : vector<32x128xf32> to vector<32x128xbf16>
    %118 = tpu.concatenate %117, %29 in 1 : vector<32x128xbf16>, vector<32x128xbf16> -> vector<32x256xbf16>
    %c0_52 = arith.constant 0 : index
    %c0_53 = arith.constant 0 : index
    %119 = vector.load %arg14[%c0_52, %c0_53] : memref<256x128xbf16, #tpu.memory_space<vmem>>, vector<256x128xbf16>
    %cst_54 = arith.constant dense<0.000000e+00> : vector<32x128xf32>
    %120 = tpu.matmul %118, %119, %cst_54 {dimension_numbers = #tpu.dot_dimension_numbers<[1], [0], [0], [1], [0, 0, 1, 1], [], []>} : vector<32x256xbf16>, vector<256x128xbf16>, vector<32x128xf32> -> vector<32x128xf32>
    %c0_55 = arith.constant 0 : index
    %c0_56 = arith.constant 0 : index
    %121 = vector.load %arg15[%c0_55, %c0_56] : memref<1x128xf32, #tpu.memory_space<vmem>>, vector<1x128xf32>
    %c0_57 = arith.constant 0 : index
    %c0_58 = arith.constant 0 : index
    %122 = vector.load %arg16[%c0_57, %c0_58] : memref<1x128xf32, #tpu.memory_space<vmem>>, vector<1x128xf32>
    %cst_59 = arith.constant dense<0.000000e+00> : vector<32xf32>
    %123 = vector.multi_reduction <add>, %120, %cst_59 [1] : vector<32x128xf32> to vector<32xf32>
    %124 = vector.shape_cast %123 : vector<32xf32> to vector<32x1xf32>
    %cst_60 = arith.constant 1.280000e+02 : f32
    %125 = vector.broadcast %cst_60 : f32 to vector<32x1xf32>
    %126 = arith.divf %124, %125 : vector<32x1xf32>
    %127 = arith.mulf %120, %120 : vector<32x128xf32>
    %cst_61 = arith.constant dense<0.000000e+00> : vector<32xf32>
    %128 = vector.multi_reduction <add>, %127, %cst_61 [1] : vector<32x128xf32> to vector<32xf32>
    %129 = vector.shape_cast %128 : vector<32xf32> to vector<32x1xf32>
    %cst_62 = arith.constant 1.280000e+02 : f32
    %130 = vector.broadcast %cst_62 : f32 to vector<32x1xf32>
    %131 = arith.divf %129, %130 : vector<32x1xf32>
    %132 = arith.mulf %126, %126 : vector<32x1xf32>
    %133 = arith.subf %131, %132 : vector<32x1xf32>
    %134 = vector.broadcast %126 : vector<32x1xf32> to vector<32x128xf32>
    %135 = arith.subf %120, %134 : vector<32x128xf32>
    %cst_63 = arith.constant 9.99999974E-6 : f32
    %136 = vector.broadcast %cst_63 : f32 to vector<32x1xf32>
    %137 = arith.addf %133, %136 : vector<32x1xf32>
    %138 = math.rsqrt %137 : vector<32x1xf32>
    %139 = vector.broadcast %138 : vector<32x1xf32> to vector<32x128xf32>
    %140 = arith.mulf %135, %139 : vector<32x128xf32>
    %141 = vector.broadcast %121 : vector<1x128xf32> to vector<32x128xf32>
    %142 = arith.mulf %140, %141 : vector<32x128xf32>
    %143 = vector.broadcast %122 : vector<1x128xf32> to vector<32x128xf32>
    %144 = arith.addf %142, %143 : vector<32x128xf32>
    %cst_64 = arith.constant 0.000000e+00 : f32
    %145 = vector.broadcast %cst_64 : f32 to vector<32x128xf32>
    %146 = arith.maximumf %144, %145 : vector<32x128xf32>
    %147 = arith.truncf %146 : vector<32x128xf32> to vector<32x128xbf16>
    %c0_65 = arith.constant 0 : index
    %c0_66 = arith.constant 0 : index
    %148 = vector.load %arg17[%c0_65, %c0_66] : memref<32x128xbf16, #tpu.memory_space<vmem>>, vector<32x128xbf16>
    tpu.vector_store %arg17[%c0_65, %c0_66], %147 {strides = array<i32>} : memref<32x128xbf16, #tpu.memory_space<vmem>>, vector<32x128xbf16>,
    return
  }
  func.func @transform_0(%arg0: i32) -> (i32, i32) {
    %c0_i32 = arith.constant 0 : i32
    %c0_i32_0 = arith.constant 0 : i32
    return %arg0, %c0_i32 : i32, i32
  }
  func.func @transform_1(%arg0: i32) -> (i32, i32) {
    %c0_i32 = arith.constant 0 : i32
    %c0_i32_0 = arith.constant 0 : i32
    %c0_i32_1 = arith.constant 0 : i32
    return %c0_i32, %c0_i32_0 : i32, i32
  }
  func.func @transform_2(%arg0: i32) -> (i32, i32) {
    %c0_i32 = arith.constant 0 : i32
    %c0_i32_0 = arith.constant 0 : i32
    %c0_i32_1 = arith.constant 0 : i32
    return %c0_i32, %c0_i32_0 : i32, i32
  }
  func.func @transform_3(%arg0: i32) -> (i32, i32) {
    %c0_i32 = arith.constant 0 : i32
    %c0_i32_0 = arith.constant 0 : i32
    %c0_i32_1 = arith.constant 0 : i32
    return %c0_i32, %c0_i32_0 : i32, i32
  }
  func.func @transform_4(%arg0: i32) -> (i32, i32) {
    %c0_i32 = arith.constant 0 : i32
    %c0_i32_0 = arith.constant 0 : i32
    %c0_i32_1 = arith.constant 0 : i32
    return %c0_i32, %c0_i32_0 : i32, i32
  }
  func.func @transform_5(%arg0: i32) -> (i32, i32) {
    %c0_i32 = arith.constant 0 : i32
    %c0_i32_0 = arith.constant 0 : i32
    %c0_i32_1 = arith.constant 0 : i32
    return %c0_i32, %c0_i32_0 : i32, i32
  }
  func.func @transform_6(%arg0: i32) -> (i32, i32) {
    %c0_i32 = arith.constant 0 : i32
    %c0_i32_0 = arith.constant 0 : i32
    %c0_i32_1 = arith.constant 0 : i32
    return %c0_i32, %c0_i32_0 : i32, i32
  }
  func.func @transform_7(%arg0: i32) -> (i32, i32) {
    %c0_i32 = arith.constant 0 : i32
    %c0_i32_0 = arith.constant 0 : i32
    %c0_i32_1 = arith.constant 0 : i32
    return %c0_i32, %c0_i32_0 : i32, i32
  }
  func.func @transform_8(%arg0: i32) -> (i32, i32) {
    %c0_i32 = arith.constant 0 : i32
    %c0_i32_0 = arith.constant 0 : i32
    %c0_i32_1 = arith.constant 0 : i32
    return %c0_i32, %c0_i32_0 : i32, i32
  }
  func.func @transform_9(%arg0: i32) -> (i32, i32) {
    %c0_i32 = arith.constant 0 : i32
    %c0_i32_0 = arith.constant 0 : i32
    %c0_i32_1 = arith.constant 0 : i32
    return %c0_i32, %c0_i32_0 : i32, i32
  }
  func.func @transform_10(%arg0: i32) -> (i32, i32) {
    %c0_i32 = arith.constant 0 : i32
    %c0_i32_0 = arith.constant 0 : i32
    %c0_i32_1 = arith.constant 0 : i32
    return %c0_i32, %c0_i32_0 : i32, i32
  }
  func.func @transform_11(%arg0: i32) -> (i32, i32) {
    %c0_i32 = arith.constant 0 : i32
    %c0_i32_0 = arith.constant 0 : i32
    %c0_i32_1 = arith.constant 0 : i32
    return %c0_i32, %c0_i32_0 : i32, i32
  }
  func.func @transform_12(%arg0: i32) -> (i32, i32) {
    %c0_i32 = arith.constant 0 : i32
    %c0_i32_0 = arith.constant 0 : i32
    %c0_i32_1 = arith.constant 0 : i32
    return %c0_i32, %c0_i32_0 : i32, i32
  }
  func.func @transform_13(%arg0: i32) -> (i32, i32) {
    %c0_i32 = arith.constant 0 : i32
    %c0_i32_0 = arith.constant 0 : i32
    %c0_i32_1 = arith.constant 0 : i32
    return %c0_i32, %c0_i32_0 : i32, i32
  }
  func.func @transform_14(%arg0: i32) -> (i32, i32) {
    %c0_i32 = arith.constant 0 : i32
    %c0_i32_0 = arith.constant 0 : i32
    %c0_i32_1 = arith.constant 0 : i32
    return %c0_i32, %c0_i32_0 : i32, i32
  }
  func.func @transform_15(%arg0: i32) -> (i32, i32) {
    %c0_i32 = arith.constant 0 : i32
    %c0_i32_0 = arith.constant 0 : i32
    %c0_i32_1 = arith.constant 0 : i32
    return %c0_i32, %c0_i32_0 : i32, i32
  }
  func.func @transform_16(%arg0: i32) -> (i32, i32) {
    %c0_i32 = arith.constant 0 : i32
    %c0_i32_0 = arith.constant 0 : i32
    return %arg0, %c0_i32 : i32, i32
  }
}

</mosaic_0001>

<bundles_post_ra>
// kernel: tpu_custom_call.1
= control target key start
LH: loop header
LB: loop body
LE: loop exit
PB: predicated region body
PF: predicated region fallthrough
CT: control target
= control target key end

     0   :  { %s3164_s0 = inlined_call_operand.hbm [shape: bf16[64,128], index: 0, kind: input, shape index: {}]   ;;  %s3165_s1 = inlined_call_operand.hbm [shape: bf16[128,128], index: 1, kind: input, shape index: {}]   ;;  %s3166_s2 = inlined_call_operand.vmem [shape: f32[1,128], index: 2, kind: input, shape index: {}]   ;;  %s3167_s3 = inlined_call_operand.vmem [shape: f32[1,128], index: 3, kind: input, shape index: {}]   ;;  %s3168_s4 = inlined_call_operand.hbm [shape: bf16[128,128], index: 4, kind: input, shape index: {}]   ;;  %s3169_s5 = inlined_call_operand.vmem [shape: f32[1,128], index: 5, kind: input, shape index: {}]   ;;  %s3170_s6 = inlined_call_operand.vmem [shape: f32[1,128], index: 6, kind: input, shape index: {}]   ;;  %s3171_s7 = inlined_call_operand.hbm [shape: bf16[128,128], index: 7, kind: input, shape index: {}]   ;;  %s3172_s8 = inlined_call_operand.vmem [shape: f32[1,128], index: 8, kind: input, shape index: {}]   ;;  %s3173_s9 = inlined_call_operand.vmem [shape: f32[1,128], index: 9, kind: input, shape index: {}]   ;;  %s3174_s10 = inlined_call_operand.hbm [shape: bf16[256,128], index: 10, kind: input, shape index: {}]   ;;  %s3175_s11 = inlined_call_operand.vmem [shape: f32[1,128], index: 11, kind: input, shape index: {}]   ;;  %s3176_s12 = inlined_call_operand.vmem [shape: f32[1,128], index: 12, kind: input, shape index: {}]   ;;  %s3177_s13 = inlined_call_operand.hbm [shape: bf16[256,128], index: 13, kind: input, shape index: {}]   ;;  %s3178_s14 = inlined_call_operand.vmem [shape: f32[1,128], index: 14, kind: input, shape index: {}]   ;;  %s3179_s15 = inlined_call_operand.vmem [shape: f32[1,128], index: 15, kind: input, shape index: {}]   ;;  %s3180_s16 = inlined_call_operand.hbm [shape: bf16[64,128], index: 16, kind: output, shape index: {}]  }
   0x1   :  { %3188 = sst [smem:[#allocation19_spill]] %s3164_s0 }
   0x2   :  { %3189 = sst [smem:[#allocation20_spill]] %s3165_s1 }
   0x3   :  { %3190 = sst [smem:[#allocation21_spill]] %s3172_s8 }
   0x4   :  { %3191 = sst [smem:[#allocation22_spill]] %s3173_s9 }
   0x5   :  { %3192 = sst [smem:[#allocation23_spill]] %s3175_s11 }
   0x6   :  { %3193 = sst [smem:[#allocation24_spill]] %s3176_s12 }
   0x7   :  { %3194 = sst [smem:[#allocation25_spill]] %s3178_s14 }
   0x8   :  { %3195 = sst [smem:[#allocation26_spill]] %s3179_s15 }
   0x9   :  { %3196 = sst [smem:[#allocation27_spill]] %s3180_s16 }
   0xa   :  { %21 = vsyncpa [#allocation3], 0 }
   0xb   :  { %23 = vsyncpa [#allocation3 + $0x1], 0 }
   0xc   :  { %24 = vsyncpa [#allocation6], 0 }
   0xd   :  { %25 = vsyncpa [#allocation9], 0 }
   0xe   :  { %26 = vsyncpa [#allocation12], 0 }
   0xf   :  { %27 = vsyncpa [#allocation4], 0 }
  0x10   :  { %29 = vsyncpa [#allocation4 + $0x1], 0  ;;  %s2699_s21 = smov 0   ;;  %s2701_s22 = smov 0  }
  0x11   :  { %s2703_s23 = smov 0   ;;  %s2705_s24 = smov 0  }
  0x12 LB: > { %s2603_s25 = smov [#allocation5]   ;;  %s2720_s27 = sadd.s32 4294967295, %s2601_s24   ;;  %s2601_s24 = sphi %s2705_s24, %s3229_s24   ;;  %s2597_s23 = sphi %s2703_s23, %s3228_s23   ;;  %s2593_s22 = sphi %s2701_s22, %s3227_s22   ;;  %s2589_s21 = sphi %s2699_s21, %s3226_s21  }
  0x13   : > { %s419_s26 = sshll.u32 %s2603_s25, 4  ;;  %p1880_p0 = scmp.ge.s32.totalorder %s2601_s24, 1  ;;  %s2725_s26 = int_to_ptr.vmem [resolvable:$true] %s419_s26 }
  0x14   : > { %p3183_p1 = scmp.eq.s32.totalorder %s2720_s27, 0  ;;  %p407_p2 = scmp.lt.s32.totalorder %s2601_s24, 3 }
  0x15   : > { %s2604_s29 = smov [#allocation8]   ;;  %s2605_s17 = smov [#allocation7]  }
  0x16   : > { %p2727_p3 = pnand %p1880_p0, %p407_p2  ;;  %s457_s30 = sshll.u32 %s2604_s29, 4  ;;  %s2740_s30 = int_to_ptr.vmem [resolvable:$true] %s457_s30 }
  0x17   : > { %s438_s18 = sshll.u32 %s2605_s17, 4  ;;  %s3199_s1 = sld [smem:[#allocation20_spill]]  ;;  %s2742_s18 = int_to_ptr.vmem [resolvable:$true] %s438_s18 }
  0x18   : > { %s3197_s28 = scalar_select %p2727_p3, 1, 0 }
  0x19   : > { %p2178_p5 = pneg %p2727_p3 }
  0x1b   : > { %p2736_p6 = pnand %p2178_p5, %p3183_p1 }
  0x1d   : > { %s2353_s25 = scalar_lea.hbm %s3199_s1, 1024  ;;  %p2752_p8 = pneg %p2736_p6 }
  0x1e   : > { %p2354_p7 = scmp.ne.s32.totalorder %s3199_s1, %s2353_s25  ;;  %p2360_p11 = scmp.lt.u32.totalorder %s2353_s25, %s3199_s1 }
  0x20   : > { %p2356_p9 = pnand %p2752_p8, %p2354_p7 }
  0x22   : > { %p2357_p10 = pneg %p2356_p9 }
  0x24   : > { %p2362_p12 = pnand %p2360_p11, %p2357_p10 }
  0x26   : > { %2365 = shalt.err (!%p2362_p12)
}
  0x27   : > { %s2366_s15 = scalar_lea.vmem %s2725_s26, 1024  ;;  %p2374_p5 = scmp.lt.s32.totalorder %s2725_s26, %s2725_s26 }
  0x28   : > { %p2367_p13 = scmp.ne.s32.totalorder %s2725_s26, %s2366_s15  ;;  %p2375_p4 = scmp.lt.s32.totalorder %s2366_s15, %s2366_s15 }
  0x2a   : > { %p2369_p0 = pnand %p2367_p13, %p2752_p8  ;;  %p2376_p7 = por %p2375_p4, %p2374_p5 }
  0x2c   : > { %p2370_p2 = pneg %p2369_p0 }
  0x2e   : > { %p2377_p9 = pnand %p2376_p7, %p2370_p2 }
  0x30   : > { %2380 = shalt.err (!%p2377_p9)
}
  0x31   : > { %s3185_s16 = smov 64   ;;  %s3186_s14 = smov 4  }
  0x32   : > { %2181 = dma.hbm_to_vmem [thread:$0]  (!%p2736_p6), %s3199_s1, 1024, %s2725_s26, [#allocation6], %s3185_s16, %s3185_s16, %s3186_s14  }
  0x33   : > { %s2381_s15 = scalar_lea.hbm %s3171_s7, 1024 }
  0x34   : > { %p2382_p4 = scmp.ne.s32.totalorder %s3171_s7, %s2381_s15  ;;  %p2388_p12 = scmp.lt.u32.totalorder %s2381_s15, %s3171_s7 }
  0x36   : > { %p2384_p10 = pnand %p2382_p4, %p2752_p8 }
  0x38   : > { %p2385_p11 = pneg %p2384_p10 }
  0x3a   : > { %p2390_p13 = pnand %p2388_p12, %p2385_p11 }
  0x3c   : > { %2393 = shalt.err (!%p2390_p13)
}
  0x3d   : > { %s2394_s26 = scalar_lea.vmem %s2740_s30, 1024  ;;  %p2402_p7 = scmp.lt.s32.totalorder %s2740_s30, %s2740_s30 }
  0x3e   : > { %p2395_p0 = scmp.ne.s32.totalorder %s2740_s30, %s2394_s26  ;;  %p2403_p9 = scmp.lt.s32.totalorder %s2394_s26, %s2394_s26 }
  0x40   : > { %p2397_p2 = pnand %p2395_p0, %p2752_p8  ;;  %p2404_p4 = por %p2403_p9, %p2402_p7 }
  0x42   : > { %p2398_p5 = pneg %p2397_p2 }
  0x44   : > { %p2405_p10 = pnand %p2404_p4, %p2398_p5 }
  0x46   : > { %2408 = shalt.err (!%p2405_p10)
}
  0x47   : > { %2187 = dma.hbm_to_vmem [thread:$0]  (!%p2736_p6), %s3171_s7, 1024, %s2740_s30, [#allocation9], %s3185_s16, %s3185_s16, %s3186_s14  }
  0x48   : > { %s2409_s19 = scalar_lea.hbm %s3168_s4, 1024 }
  0x49   : > { %p2410_p11 = scmp.ne.s32.totalorder %s3168_s4, %s2409_s19  ;;  %p2416_p0 = scmp.lt.u32.totalorder %s2409_s19, %s3168_s4 }
  0x4b   : > { %p2412_p12 = pnand %p2410_p11, %p2752_p8 }
  0x4d   : > { %p2413_p13 = pneg %p2412_p12 }
  0x4f   : > { %p2418_p2 = pnand %p2416_p0, %p2413_p13 }
  0x51   : > { %2421 = shalt.err (!%p2418_p2)
}
  0x52   : > { %s2422_s30 = scalar_lea.vmem %s2742_s18, 1024  ;;  %p2430_p4 = scmp.lt.s32.totalorder %s2742_s18, %s2742_s18 }
  0x53   : > { %p2423_p5 = scmp.ne.s32.totalorder %s2742_s18, %s2422_s30  ;;  %p2431_p10 = scmp.lt.s32.totalorder %s2422_s30, %s2422_s30 }
  0x55   : > { %p2425_p7 = pnand %p2423_p5, %p2752_p8  ;;  %p2432_p11 = por %p2431_p10, %p2430_p4 }
  0x57   : > { %p2426_p9 = pneg %p2425_p7 }
  0x59   : > { %p2433_p12 = pnand %p2432_p11, %p2426_p9 }
  0x5b   : > { %2436 = shalt.err (!%p2433_p12)
}
  0x5c   : > { %2184 = dma.hbm_to_vmem [thread:$0]  (!%p2736_p6), %s3168_s4, 1024, %s2742_s18, [#allocation6], %s3185_s16, %s3185_s16, %s3186_s14  }
  0x5d   : > { %s2608_s9 = smov [#allocation10]   ;;  %s2609_s12 = smov [#allocation11]  }
  0x5e   : > { %s476_s11 = sshll.u32 %s2608_s9, 4  ;;  %s495_s19 = sshll.u32 %s2609_s12, 4  ;;  %s477_s11 = int_to_ptr.vmem [resolvable:$true] %s476_s11  ;;  %s496_s19 = int_to_ptr.vmem [resolvable:$true] %s495_s19 }
  0x5f   : > { %s2437_s17 = scalar_lea.hbm %s3174_s10, 2048 }
  0x60   : > { %p2438_p13 = scmp.ne.s32.totalorder %s3174_s10, %s2437_s17  ;;  %p2444_p5 = scmp.lt.u32.totalorder %s2437_s17, %s3174_s10 }
  0x62   : > { %p2440_p0 = pnand %p2438_p13, %p2752_p8 }
  0x64   : > { %p2441_p2 = pneg %p2440_p0 }
  0x66   : > { %p2446_p7 = pnand %p2444_p5, %p2441_p2 }
  0x68   : > { %2449 = shalt.err (!%p2446_p7)
}
  0x69   : > { %s2450_s18 = scalar_lea.vmem %s477_s11, 2048  ;;  %p2458_p11 = scmp.lt.s32.totalorder %s477_s11, %s477_s11 }
  0x6a   : > { %p2451_p9 = scmp.ne.s32.totalorder %s477_s11, %s2450_s18  ;;  %p2459_p12 = scmp.lt.s32.totalorder %s2450_s18, %s2450_s18 }
  0x6c   : > { %p2453_p4 = pnand %p2451_p9, %p2752_p8  ;;  %p2460_p1 = por %p2459_p12, %p2458_p11 }
  0x6e   : > { %p2454_p10 = pneg %p2453_p4 }
  0x70   : > { %p2461_p3 = pnand %p2460_p1, %p2454_p10 }
  0x72   : > { %2464 = shalt.err (!%p2461_p3)
}
  0x73   : > { %2190 = dma.hbm_to_vmem [thread:$0]  (!%p2736_p6), %s3174_s10, 2048, %s477_s11, [#allocation9], %s3185_s16, %s3185_s16, %s3186_s14  }
  0x74   : > { %s2465_s20 = scalar_lea.hbm %s3177_s13, 2048 }
  0x75   : > { %p2466_p1 = scmp.ne.s32.totalorder %s3177_s13, %s2465_s20  ;;  %p2472_p0 = scmp.lt.u32.totalorder %s2465_s20, %s3177_s13 }
  0x77   : > { %p2468_p3 = pnand %p2466_p1, %p2752_p8 }
  0x79   : > { %p2469_p13 = pneg %p2468_p3 }
  0x7b   : > { %p2474_p2 = pnand %p2472_p0, %p2469_p13 }
  0x7d   : > { %2477 = shalt.err (!%p2474_p2)
}
  0x7e   : > { %s2478_s26 = scalar_lea.vmem %s496_s19, 2048  ;;  %p2486_p4 = scmp.lt.s32.totalorder %s496_s19, %s496_s19 }
  0x7f   : > { %p2479_p5 = scmp.ne.s32.totalorder %s496_s19, %s2478_s26  ;;  %p2487_p10 = scmp.lt.s32.totalorder %s2478_s26, %s2478_s26 }
  0x81   : > { %p2481_p7 = pnand %p2479_p5, %p2752_p8  ;;  %p2488_p11 = por %p2487_p10, %p2486_p4 }
  0x83   : > { %p2482_p9 = pneg %p2481_p7 }
  0x85   : > { %p2489_p12 = pnand %p2488_p11, %p2482_p9 }
  0x87   : > { %2492 = shalt.err (!%p2489_p12)
}
  0x88   : > { %2193 = dma.hbm_to_vmem [thread:$0]  (!%p2736_p6), %s3177_s13, 2048, %s496_s19, [#allocation12], %s3185_s16, %s3185_s16, %s3186_s14  }
  0x89   : > { %s1879_s0 = sadd.s32 4294967294, %s2601_s24   ;;  %s2872_s29 = sadd.s32 1, %s2601_s24  }
  0x8a   : > { %s42_s1 = sadd.s32 1, %s2597_s23  ;;  %s39_s8 = ssub.s32 %s2601_s24, %s2872_s29 }
  0x8b   : > { %p49_p8 = scmp.ne.s32.totalorder %s2597_s23, %s2593_s22  ;;  %p40_p1 = scmp.eq.s32.totalorder %s39_s8, 0 }
  0x8c   : > { %p50_p3 = scmp.eq.s32.totalorder %s2601_s24, 0  ;;  %p55_p13 = scmp.ne.s32.totalorder %s2593_s22, %s2589_s21 }
  0x8d   : > { %p394_p0 = scmp.eq.s32.totalorder %s2720_s27, 1  ;;  %p3201_p5 = scmp.eq.s32.totalorder %s2720_s27, 0 }
  0x8e   : > { %s2884_s9 = scalar_select %p40_p1, %s2597_s23, %s42_s1  }
  0x8f   : > { %p51_p2 = por %p50_p3, %p49_p8  ;;  %p2888_p7 = por %p3201_p5, %p55_p13 }
  0x90   : > { %p2892_p6 = por %p394_p0, %p49_p8  ;;  %p400_p9 = scmp.eq.s32.totalorder %s1879_s0, 1 }
  0x91   : > { %p2207_p4 = scmp.lt.s32.totalorder %s2601_s24, 2  ;;  %s515_s20 = sand.u32 1, %s2597_s23  }
  0x92   : > { %s3203_s19 = scalar_select %p2892_p6, 1, 0 }
  0x93   : > { %p2898_p10 = por %p400_p9, %p55_p13  ;;  %s1887_s17 = sshll.u32 %s515_s20, 4 }
  0x94   : > { %s1975_s15 = sshll.u32 %s2601_s24, 8  ;;  %s3205_s11 = sld [smem:[#allocation19_spill]] }
  0x95   : > { %s3204_s25 = scalar_select %p2898_p10, 1, 0 }
  0x96   : > { %s519_s1 = scalar_lea.vmem [#allocation2], %s1887_s17  ;;  %p2908_p11 = pnand %p2207_p4, %p51_p2 }
  0x97   : > { %s526_s8 = sshll.u32 %s519_s1, 4  ;;  %s2914_s16 = scalar_lea.sflag [#allocation3], %s515_s20  ;;  %s2912_s8 = int_to_ptr.vmem [resolvable:$true] %s526_s8 }
  0x98   : > { %p2495_p8 = pneg %p2908_p11 }
  0x9a   : > { %s2906_s18 = scalar_lea.hbm %s3205_s11, %s1975_s15  ;;  %s2498_s30 = scalar_lea.hbm %s3205_s11, 512 }
  0x9b   : > { %s2493_s14 = scalar_lea.hbm %s2906_s18, 256  ;;  %p2499_p13 = scmp.lt.u32.totalorder %s2906_s18, %s3205_s11 }
  0x9c   : > { %p2494_p12 = scmp.ne.s32.totalorder %s2906_s18, %s2493_s14  ;;  %p2500_p0 = scmp.lt.u32.totalorder %s2498_s30, %s2493_s14 }
  0x9d   : > { %p2502_p5 = scmp.lt.u32.totalorder %s2493_s14, %s2906_s18 }
  0x9e   : > { %p2496_p1 = pnand %p2495_p8, %p2494_p12  ;;  %p2501_p2 = por %p2500_p0, %p2499_p13 }
  0xa0   : > { %p2497_p3 = pneg %p2496_p1  ;;  %p2503_p9 = por %p2502_p5, %p2501_p2 }
  0xa2   : > { %p2504_p4 = pnand %p2503_p9, %p2497_p3 }
  0xa4   : > { %2507 = shalt.err (!%p2504_p4)
}
  0xa5   : > { %s2508_s20 = scalar_lea.vmem %s2912_s8, 256  ;;  %s2610_s17 = smov [#allocation2]  }
  0xa6   : > { %p2509_p12 = scmp.ne.s32.totalorder %s2912_s8, %s2508_s20  ;;  %s2513_s15 = sshll.u32 %s2610_s17, 4  ;;  %s2514_s15 = int_to_ptr.vmem [resolvable:$false] %s2513_s15 }
  0xa7   : > { %s2515_s26 = scalar_lea.vmem %s2514_s15, 512  ;;  %p2516_p6 = scmp.lt.s32.totalorder %s2912_s8, %s2514_s15 }
  0xa8   : > { %p2511_p1 = pnand %p2509_p12, %p2495_p8  ;;  %p2517_p13 = scmp.lt.s32.totalorder %s2515_s26, %s2508_s20 }
  0xaa   : > { %p2512_p10 = pneg %p2511_p1  ;;  %p2518_p0 = por %p2517_p13, %p2516_p6 }
  0xac   : > { %p2519_p2 = pnand %p2518_p0, %p2512_p10 }
  0xae   : > { %2522 = shalt.err (!%p2519_p2)
}
  0xaf   : > { %s3207_s14 = smov 4   ;;  %s3208_s30 = smov 64  }
  0xb0   : > { %2197 = dma.hbm_to_vmem [thread:$0]  (!%p2908_p11), %s2906_s18, 256, %s2912_s8, %s2914_s16, %s3208_s30, %s3208_s30, %s3207_s14  }
  0xb1   : > { %p3209_p8 = scmp.ne.s32.totalorder %s3197_s28, 0 }
  0xb2   : > { %s2948_s1 = sand.u32 (!%p3209_p8), 1, %s2593_s22  }
  0xb3   : > { %538 = sbr.rel (%p3209_p8) target bundleno = 2210 (0x8a2), region = 84  ;;  %s1891_s20 = sshll.u32 (!%p3209_p8), %s2948_s1, 4 }
  0xb4   : > { %s541_s17 = scalar_lea.sflag (!%p3209_p8), [#allocation3], %s2948_s1  ;;  %s2954_s0 = scalar_lea.vmem (!%p3209_p8), [#allocation2], %s1891_s20 }
  0xba   : > { %2568 = dma.done.wait (%p2888_p7), %s541_s17, 256  }
  0xbb   : > { %2570 = vsyncadd (%p2888_p7), %s541_s17, 4294967040  ;;  %p3210_p6 = scmp.eq.s32.totalorder %s2720_s27, 0 }
  0xbd   : > { %2572 = dma.done.wait (%p3210_p6), [#allocation6], 2048   ;;  %p3211_p10 = pmov %p3210_p6 }
  0xbe   : > { %p3212_p11 = pmov %p3210_p6 }
  0xbf   : > { %2574 = vsyncadd (%p3211_p10), [#allocation6], 4294965248 }
  0xc0   : > { %2576 = dma.done.wait (%p3212_p11), [#allocation9], 3072   ;;  %p3213_p3 = pmov %p3210_p6 }
  0xc2   : > { %2578 = vsyncadd (%p3213_p3), [#allocation9], 4294964224  ;;  %p3214_p5 = pmov %p3213_p3 }
  0xc3   : > { %p3215_p9 = pmov %p3213_p3 }
  0xc4   : > { %2580 = dma.done.wait (%p3214_p5), [#allocation12], 2048  }
  0xc5   : > { %2582 = vsyncadd (%p3215_p9), [#allocation12], 4294965248  ;;  %v2255_v0 = vld [vmem:[#allocation5] sm:$0xff]   ;;  %v2256_v1 = vld [vmem:[#allocation5 + $0x8] sm:$0xff]   ;;  %s3217_s12 = sld [smem:[#allocation22_spill]]  ;;  %s3218_s15 = sld [smem:[#allocation23_spill]] }
  0xc6   : > { %2078 = vmatprep.subr.bf16.mxu0 %v2255_v0  ;;  %v2257_v2 = vld [vmem:[#allocation5 + $0x10] sm:$0xff]   ;;  %v2258_v3 = vld [vmem:[#allocation5 + $0x18] sm:$0xff]   ;;  %v2259_v5 = vld [vmem:[#allocation5 + $0x20] sm:$0xff]   ;;  %s3219_s30 = sld [smem:[#allocation24_spill]]  ;;  %s3220_s28 = sld [smem:[#allocation25_spill]] }
  0xc7   : > { %2079 = vmatpush3.bf16.msra.mxu0 %v2255_v0  ;;  %v2263_v4 = vld [vmem:[%s2954_s0] sm:$0xff]   ;;  %v2260_v6 = vld [vmem:[#allocation5 + $0x28] sm:$0xff]   ;;  %v2262_v8 = vld [vmem:[#allocation5 + $0x38] sm:$0xff]   ;;  %s3221_s18 = sld [smem:[#allocation26_spill]]  ;;  %s612_s8 = scalar_lea.vmem [#allocation13], %s1891_s20 }
  0xc8   : > { %2080 = vmatprep.subr.bf16.mxu0 %v2256_v1  ;;  %2094 = vmatprep.mubr.bf16.mxu0 %v2263_v4  ;;  %v2261_v7 = vld [vmem:[#allocation5 + $0x30] sm:$0xff]   ;;  %v2264_v9 = vld [vmem:[%s2954_s0 + $0x8] sm:$0xff]   ;;  %v2265_v18 = vld [vmem:[#allocation7] sm:$0xff]   ;;  %s3216_s0 = sld [smem:[#allocation21_spill]]  ;;  %s1758_s26 = sshll.u32 %s612_s8, 4  ;;  %s3120_s26 = int_to_ptr.vmem [resolvable:$true] %s1758_s26 }
  0xc9   : > { %2098 = vmatprep.subr.bf16.mxu1 %v2265_v18  ;;  %v2266_v19 = vld [vmem:[#allocation7 + $0x8] sm:$0xff]   ;;  %v2267_v20 = vld [vmem:[#allocation7 + $0x10] sm:$0xff]   ;;  %v2268_v21 = vld [vmem:[#allocation7 + $0x18] sm:$0xff]   ;;  %s3222_s17 = sld [smem:[#allocation27_spill]]  ;;  %s2523_s20 = scalar_lea.vmem %s3120_s26, 256 }
  0xca   : > { %2099 = vmatpush3.bf16.msra.mxu1 %v2265_v18  ;;  %v2269_v22 = vld [vmem:[#allocation7 + $0x20] sm:$0xff]   ;;  %v2270_v23 = vld [vmem:[#allocation7 + $0x28] sm:$0xff]   ;;  %v2271_v24 = vld [vmem:[#allocation7 + $0x30] sm:$0xff]   ;;  %p2524_p7 = scmp.ne.s32.totalorder %s3120_s26, %s2523_s20  ;;  %p3223_p4 = scmp.ne.s32.totalorder %s3203_s19, 0 }
  0xcb   : > { %2081 = vmatpush3.bf16.msra.mxu0 %v2256_v1  ;;  %2100 = vmatprep.subr.bf16.mxu1 %v2266_v19  ;;  %v2272_v25 = vld [vmem:[#allocation7 + $0x38] sm:$0xff]   ;;  %v1908_v57 = vld [vmem:[%s3166_s2] ss:$0 sm:$0xff] }
  0xcc   : > { %2082 = vmatprep.subr.bf16.mxu0 %v2257_v2  ;;  %v1909_v60 = vld [vmem:[%s3167_s3] ss:$0 sm:$0xff]  ;;  %p2525_p12 = pnand %p2524_p7, %p3223_p4 }
  0xce   : > { %2101 = vmatpush3.bf16.msra.mxu1 %v2266_v19  ;;  %p2526_p1 = pneg %p2525_p12 }
  0xcf   : > { %2083 = vmatpush3.bf16.msra.mxu0 %v2257_v2  ;;  %2102 = vmatprep.subr.bf16.mxu1 %v2267_v20 }
  0xd0   : > { %2084 = vmatprep.subr.bf16.mxu0 %v2258_v3 }
  0xd2   : > { %2103 = vmatpush3.bf16.msra.mxu1 %v2267_v20 }
  0xd3   : > { %2085 = vmatpush3.bf16.msra.mxu0 %v2258_v3  ;;  %2104 = vmatprep.subr.bf16.mxu1 %v2268_v21 }
  0xd4   : > { %2086 = vmatprep.subr.bf16.mxu0 %v2259_v5 }
  0xd6   : > { %2105 = vmatpush3.bf16.msra.mxu1 %v2268_v21 }
  0xd7   : > { %2087 = vmatpush3.bf16.msra.mxu0 %v2259_v5  ;;  %2106 = vmatprep.subr.bf16.mxu1 %v2269_v22 }
  0xd8   : > { %2088 = vmatprep.subr.bf16.mxu0 %v2260_v6 }
  0xda   : > { %2107 = vmatpush3.bf16.msra.mxu1 %v2269_v22 }
  0xdb   : > { %2089 = vmatpush3.bf16.msra.mxu0 %v2260_v6  ;;  %2108 = vmatprep.subr.bf16.mxu1 %v2270_v23 }
  0xdc   : > { %2090 = vmatprep.subr.bf16.mxu0 %v2261_v7 }
  0xde   : > { %2109 = vmatpush3.bf16.msra.mxu1 %v2270_v23 }
  0xdf   : > { %2091 = vmatpush3.bf16.msra.mxu0 %v2261_v7  ;;  %2110 = vmatprep.subr.bf16.mxu1 %v2271_v24 }
  0xe0   : > { %2092 = vmatprep.subr.bf16.mxu0 %v2262_v8 }
  0xe2   : > { %2111 = vmatpush3.bf16.msra.mxu1 %v2271_v24 }
  0xe3   : > { %2093 = vmatpush3.bf16.msra.mxu0 %v2262_v8  ;;  %2112 = vmatprep.subr.bf16.mxu1 %v2272_v25 }
  0xe6   : > { %2095 = vmatmul.mubr.bf16.vlgmr.msra.gmra.mrb[0].mxu0 %v2264_v9  ;;  %2113 = vmatpush3.bf16.msra.mxu1 %v2272_v25 }
 0x1b9   : > { %v2974_v10 = vpop.f32.mrb[0].mxu0 }
 0x1ba   : > { %751 = vadd.xlane.f32.xlu1 %v2974_v10  ;;  %v2977_v11 = vpop.f32.mrb[1].mxu0  ;;  %v762_v17 = vmul.f32 %v2974_v10, %v2974_v10 }
 0x1bb   : > { %747 = vadd.xlane.f32.xlu0 %v2977_v11  ;;  %v2980_v12 = vpop.f32.mrb[2].mxu0  ;;  %v760_v15 = vmul.f32 %v2977_v11, %v2977_v11 }
 0x1bc   : > { %v2982_v13 = vpop.f32.mrb[3].mxu0  ;;  %v763_v16 = vmul.f32 %v2980_v12, %v2980_v12 }
 0x1bd   : > { %v761_v14 = vmul.f32 %v2982_v13, %v2982_v13 }
 0x1be   : > { %753 = vadd.xlane.f32.xlu1 %v2980_v12 }
 0x1bf   : > { %749 = vadd.xlane.f32.xlu0 %v2982_v13 }
 0x1c2   : > { %766 = vadd.xlane.f32.xlu1 %v761_v14 }
 0x1c3   : > { %764 = vadd.xlane.f32.xlu0 %v760_v15 }
 0x1c6   : > { %770 = vadd.xlane.f32.xlu1 %v763_v16 }
 0x1c7   : > { %768 = vadd.xlane.f32.xlu0 %v762_v17 }
 0x247   : > { %v752_v26 = vpop.xlane.xlu1 %751 }
 0x248   : > { %v748_v27 = vpop.xlane.xlu0 %747  ;;  %v758_v37 = vmul.f32 0.0078125, %v752_v26  ;;  %v2273_v26 = vld [vmem:[#allocation8] sm:$0xff]  }
 0x249   : > { %v756_v30 = vmul.f32 0.0078125, %v748_v27  ;;  %2118 = vmatprep.subr.bf16.mxu0 %v2273_v26  ;;  %v2274_v27 = vld [vmem:[#allocation8 + $0x8] sm:$0xff]  }
 0x24a   : > { %v778_v47 = vmul.f32 %v758_v37, %v758_v37  ;;  %v786_v1 = vsub.f32 %v2974_v10, %v758_v37  ;;  %2119 = vmatpush3.bf16.msra.mxu0 %v2273_v26 }
 0x24b   : > { %v754_v28 = vpop.xlane.xlu1 %753  ;;  %v776_v38 = vmul.f32 %v756_v30, %v756_v30  ;;  %v784_v56 = vsub.f32 %v2977_v11, %v756_v30  ;;  %2120 = vmatprep.subr.bf16.mxu0 %v2274_v27  ;;  %v2277_v30 = vld [vmem:[#allocation8 + $0x20] sm:$0xff]  }
 0x24c   : > { %v750_v29 = vpop.xlane.xlu0 %749  ;;  %v759_v34 = vmul.f32 0.0078125, %v754_v28  ;;  %v2275_v28 = vld [vmem:[#allocation8 + $0x10] sm:$0xff]  }
 0x24d   : > { %v757_v31 = vmul.f32 0.0078125, %v750_v29  ;;  %v2276_v29 = vld [vmem:[#allocation8 + $0x18] sm:$0xff]  }
 0x24e   : > { %v779_v43 = vmul.f32 %v759_v34, %v759_v34  ;;  %v787_v62 = vsub.f32 %v2980_v12, %v759_v34  ;;  %2121 = vmatpush3.bf16.msra.mxu0 %v2274_v27 }
 0x24f   : > { %v777_v32 = vmul.f32 %v757_v31, %v757_v31  ;;  %v767_v33 = vpop.xlane.xlu1 %766  ;;  %v785_v54 = vsub.f32 %v2982_v13, %v757_v31  ;;  %2122 = vmatprep.subr.bf16.mxu0 %v2275_v28  ;;  %v2278_v31 = vld [vmem:[#allocation8 + $0x28] sm:$0xff]  }
 0x250   : > { %v773_v35 = vmul.f32 0.0078125, %v767_v33  ;;  %v765_v36 = vpop.xlane.xlu0 %764  ;;  %v2280_v33 = vld [vmem:[#allocation8 + $0x38] sm:$0xff]  }
 0x251   : > { %v772_v39 = vmul.f32 0.0078125, %v765_v36 }
 0x252   : > { %v781_v40 = vsub.f32 %v773_v35, %v777_v32  ;;  %2123 = vmatpush3.bf16.msra.mxu0 %v2275_v28  ;;  %v2279_v32 = vld [vmem:[#allocation8 + $0x30] sm:$0xff]  }
 0x253   : > { %v780_v41 = vsub.f32 %v772_v39, %v776_v38  ;;  %v771_v42 = vpop.xlane.xlu1 %770  ;;  %2124 = vmatprep.subr.bf16.mxu0 %v2276_v29 }
 0x254   : > { %v789_v44 = vadd.f32 1e-05, %v781_v40  ;;  %v775_v45 = vmul.f32 0.0078125, %v771_v42  ;;  %v769_v46 = vpop.xlane.xlu0 %768 }
 0x255   : > { %v788_v48 = vadd.f32 1e-05, %v780_v41  ;;  %v774_v49 = vmul.f32 0.0078125, %v769_v46 }
 0x256   : > { %2313 = vrsqrt.f32 %v789_v44  ;;  %v783_v50 = vsub.f32 %v775_v45, %v779_v43  ;;  %2125 = vmatpush3.bf16.msra.mxu0 %v2276_v29 }
 0x257   : > { %2315 = vrsqrt.f32 %v788_v48  ;;  %v782_v51 = vsub.f32 %v774_v49, %v778_v47  ;;  %2126 = vmatprep.subr.bf16.mxu0 %v2277_v30 }
 0x258   : > { %v791_v52 = vadd.f32 1e-05, %v783_v50 }
 0x259   : > { %v790_v53 = vadd.f32 1e-05, %v782_v51 }
 0x25a   : > { %2317 = vrsqrt.f32 %v791_v52  ;;  %2127 = vmatpush3.bf16.msra.mxu0 %v2277_v30 }
 0x25b   : > { %2319 = vrsqrt.f32 %v790_v53  ;;  %2128 = vmatprep.subr.bf16.mxu0 %v2278_v31 }
 0x25e   : > { %2129 = vmatpush3.bf16.msra.mxu0 %v2278_v31 }
 0x25f   : > { %2130 = vmatprep.subr.bf16.mxu0 %v2279_v32 }
 0x260   : > { %v2314_v55 = vpop.eup %2313 }
 0x261   : > { %v2316_v58 = vpop.eup %2315  ;;  %v797_v59 = vmul.f32 %v2314_v55, %v785_v54 }
 0x262   : > { %v796_v61 = vmul.f32 %v2316_v58, %v784_v56  ;;  %2131 = vmatpush3.bf16.msra.mxu0 %v2279_v32 }
 0x263   : > { %v807_v63 = vmul.f32 %v1908_v57, %v797_v59  ;;  %2132 = vmatprep.subr.bf16.mxu0 %v2280_v33 }
 0x264   : > { %v2318_v0 = vpop.eup %2317  ;;  %v806_v2 = vmul.f32 %v1908_v57, %v796_v61 }
 0x265   : > { %v2320_v3 = vpop.eup %2319  ;;  %v817_v4 = vadd.f32 %v1909_v60, %v807_v63  ;;  %v799_v5 = vmul.f32 %v2318_v0, %v787_v62  ;;  %v1918_v0 = vld [vmem:[%s3169_s5] ss:$0 sm:$0xff] }
 0x266   : > { %v816_v6 = vadd.f32 %v1909_v60, %v806_v2  ;;  %v798_v7 = vmul.f32 %v2320_v3, %v786_v1  ;;  %2133 = vmatpush3.bf16.msra.mxu0 %v2280_v33 }
 0x267   : > { %v821_v8 = vmax.f32 %v817_v4, 0.0  ;;  %v809_v9 = vmul.f32 %v1908_v57, %v799_v5  ;;  %v1919_v4 = vld [vmem:[%s3170_s6] ss:$0 sm:$0xff] }
 0x268   : > { %v820_v11 = vmax.f32 %v816_v6, 0.0  ;;  %v808_v13 = vmul.f32 %v1908_v57, %v798_v7 }
 0x269   : > { %v819_v14 = vadd.f32 %v1909_v60, %v809_v9 }
 0x26a   : > { %v3004_v15 = vpack.c.bf16 %v821_v8, %v820_v11  ;;  %v818_v16 = vadd.f32 %v1909_v60, %v808_v13 }
 0x26b   : > { %v823_v17 = vmax.f32 %v819_v14, 0.0 }
 0x26c   : > { %2114 = vmatprep.mubr.bf16.mxu1 %v3004_v15  ;;  %v822_v12 = vmax.f32 %v818_v16, 0.0 }
 0x26e   : > { %v3007_v18 = vpack.c.bf16 %v823_v17, %v822_v12 }
 0x270   : > { %2115 = vmatmul.mubr.bf16.vlgmr.msra.gmra.mrb[0].mxu1 %v3007_v18 }
 0x343   : > { %v3010_v10 = vpop.f32.mrb[0].mxu1 }
 0x344   : > { %945 = vadd.xlane.f32.xlu0 %v3010_v10  ;;  %v3013_v19 = vpop.f32.mrb[1].mxu1  ;;  %v955_v24 = vmul.f32 %v3010_v10, %v3010_v10 }
 0x345   : > { %v3015_v20 = vpop.f32.mrb[2].mxu1  ;;  %v953_v22 = vmul.f32 %v3013_v19, %v3013_v19 }
 0x346   : > { %947 = vadd.xlane.f32.xlu1 %v3015_v20  ;;  %v3018_v21 = vpop.f32.mrb[3].mxu1  ;;  %v956_v25 = vmul.f32 %v3015_v20, %v3015_v20 }
 0x347   : > { %v954_v23 = vmul.f32 %v3018_v21, %v3018_v21 }
 0x348   : > { %941 = vadd.xlane.f32.xlu0 %v3013_v19 }
 0x34a   : > { %943 = vadd.xlane.f32.xlu1 %v3018_v21 }
 0x34c   : > { %957 = vadd.xlane.f32.xlu0 %v953_v22 }
 0x34e   : > { %959 = vadd.xlane.f32.xlu1 %v954_v23 }
 0x350   : > { %961 = vadd.xlane.f32.xlu0 %v955_v24 }
 0x352   : > { %963 = vadd.xlane.f32.xlu1 %v956_v25 }
 0x3d1   : > { %v946_v34 = vpop.xlane.xlu0 %945 }
 0x3d2   : > { %v951_v41 = vmul.f32 0.0078125, %v946_v34 }
 0x3d3   : > { %v948_v35 = vpop.xlane.xlu1 %947 }
 0x3d4   : > { %v952_v44 = vmul.f32 0.0078125, %v948_v35  ;;  %v971_v50 = vmul.f32 %v951_v41, %v951_v41  ;;  %v979_v5 = vsub.f32 %v3010_v10, %v951_v41  ;;  %v2281_v35 = vld [vmem:[#allocation10 + $0x40] sm:$0xff]   ;;  %v2287_v41 = vld [vmem:[#allocation10 + $0x58] sm:$0xff]  }
 0x3d5   : > { %v942_v36 = vpop.xlane.xlu0 %941  ;;  %2022 = vmatprep.subr.bf16.mxu1 %v2281_v35 }
 0x3d6   : > { %v949_v37 = vmul.f32 0.0078125, %v942_v36  ;;  %v972_v54 = vmul.f32 %v952_v44, %v952_v44  ;;  %v980_v9 = vsub.f32 %v3015_v20, %v952_v44  ;;  %v2282_v36 = vld [vmem:[#allocation10] sm:$0xff]  }
 0x3d7   : > { %v944_v38 = vpop.xlane.xlu1 %943  ;;  %2023 = vmatpush3.bf16.msra.mxu1 %v2282_v36  ;;  %v2290_v44 = vld [vmem:[#allocation10 + $0x20] sm:$0xff]  }
 0x3d8   : > { %v950_v39 = vmul.f32 0.0078125, %v944_v38  ;;  %v969_v42 = vmul.f32 %v949_v37, %v949_v37  ;;  %v977_v62 = vsub.f32 %v3013_v19, %v949_v37  ;;  %v2283_v37 = vld [vmem:[#allocation10 + $0x48] sm:$0xff]  }
 0x3d9   : > { %v958_v40 = vpop.xlane.xlu0 %957  ;;  %v2284_v38 = vld [vmem:[#allocation10 + $0x8] sm:$0xff]   ;;  %2024 = vmatprep.subr.bf16.mxu1 %v2283_v37 }
 0x3da   : > { %v965_v43 = vmul.f32 0.0078125, %v958_v40  ;;  %v970_v46 = vmul.f32 %v950_v39, %v950_v39  ;;  %v978_v1 = vsub.f32 %v3018_v21, %v950_v39  ;;  %v2285_v39 = vld [vmem:[#allocation10 + $0x50] sm:$0xff]  }
 0x3db   : > { %v960_v45 = vpop.xlane.xlu1 %959  ;;  %2025 = vmatpush3.bf16.msra.mxu1 %v2284_v38  ;;  %v2286_v40 = vld [vmem:[#allocation10 + $0x10] sm:$0xff]  }
 0x3dc   : > { %v973_v47 = vsub.f32 %v965_v43, %v969_v42  ;;  %v966_v48 = vmul.f32 0.0078125, %v960_v45  ;;  %2026 = vmatprep.subr.bf16.mxu1 %v2285_v39  ;;  %v2288_v42 = vld [vmem:[#allocation10 + $0x18] sm:$0xff]   ;;  %v2289_v43 = vld [vmem:[#allocation10 + $0x60] sm:$0xff]   ;;  %v2291_v45 = vld [vmem:[#allocation10 + $0x68] sm:$0xff]  }
 0x3dd   : > { %v962_v49 = vpop.xlane.xlu0 %961 }
 0x3de   : > { %v981_v51 = vadd.f32 1e-05, %v973_v47  ;;  %v974_v52 = vsub.f32 %v966_v48, %v970_v46  ;;  %v967_v53 = vmul.f32 0.0078125, %v962_v49  ;;  %v2292_v46 = vld [vmem:[#allocation10 + $0x28] sm:$0xff]   ;;  %v2293_v47 = vld [vmem:[#allocation10 + $0x70] sm:$0xff]   ;;  %v2295_v49 = vld [vmem:[#allocation10 + $0x78] sm:$0xff]  }
 0x3df   : > { %v964_v55 = vpop.xlane.xlu1 %963  ;;  %2027 = vmatpush3.bf16.msra.mxu1 %v2286_v40  ;;  %v2294_v48 = vld [vmem:[#allocation10 + $0x30] sm:$0xff]  }
 0x3e0   : > { %2321 = vrsqrt.f32 %v981_v51  ;;  %v982_v56 = vadd.f32 1e-05, %v974_v52  ;;  %v975_v57 = vsub.f32 %v967_v53, %v971_v50  ;;  %v968_v58 = vmul.f32 0.0078125, %v964_v55  ;;  %2028 = vmatprep.subr.bf16.mxu1 %v2287_v41  ;;  %v2296_v50 = vld [vmem:[#allocation10 + $0x38] sm:$0xff]  }
 0x3e2   : > { %2323 = vrsqrt.f32 %v982_v56  ;;  %v983_v59 = vadd.f32 1e-05, %v975_v57  ;;  %v976_v60 = vsub.f32 %v968_v58, %v972_v54 }
 0x3e3   : > { %2029 = vmatpush3.bf16.msra.mxu1 %v2288_v42 }
 0x3e4   : > { %2325 = vrsqrt.f32 %v983_v59  ;;  %v984_v61 = vadd.f32 1e-05, %v976_v60  ;;  %2030 = vmatprep.subr.bf16.mxu1 %v2289_v43 }
 0x3e6   : > { %2327 = vrsqrt.f32 %v984_v61 }
 0x3e7   : > { %2031 = vmatpush3.bf16.msra.mxu1 %v2290_v44 }
 0x3e8   : > { %2032 = vmatprep.subr.bf16.mxu1 %v2291_v45 }
 0x3ea   : > { %v2322_v63 = vpop.eup %2321 }
 0x3eb   : > { %v989_v2 = vmul.f32 %v2322_v63, %v977_v62  ;;  %2033 = vmatpush3.bf16.msra.mxu1 %v2292_v46 }
 0x3ec   : > { %v2324_v3 = vpop.eup %2323  ;;  %2034 = vmatprep.subr.bf16.mxu1 %v2293_v47 }
 0x3ed   : > { %v990_v6 = vmul.f32 %v2324_v3, %v978_v1  ;;  %v999_v7 = vmul.f32 %v1918_v0, %v989_v2 }
 0x3ee   : > { %v2326_v8 = vpop.eup %2325 }
 0x3ef   : > { %v1000_v11 = vmul.f32 %v1918_v0, %v990_v6  ;;  %v1009_v13 = vadd.f32 %v1919_v4, %v999_v7  ;;  %v991_v14 = vmul.f32 %v2326_v8, %v979_v5  ;;  %2035 = vmatpush3.bf16.msra.mxu1 %v2294_v48 }
 0x3f0   : > { %v2328_v16 = vpop.eup %2327  ;;  %2036 = vmatprep.subr.bf16.mxu1 %v2295_v49 }
 0x3f1   : > { %v1010_v17 = vadd.f32 %v1919_v4, %v1000_v11  ;;  %v992_v12 = vmul.f32 %v2328_v16, %v980_v9  ;;  %v1001_v19 = vmul.f32 %v1918_v0, %v991_v14  ;;  %v1013_v21 = vmax.f32 %v1009_v13, 0.0 }
 0x3f3   : > { %v1014_v22 = vmax.f32 %v1010_v17, 0.0  ;;  %v1002_v23 = vmul.f32 %v1918_v0, %v992_v12  ;;  %v1011_v24 = vadd.f32 %v1919_v4, %v1001_v19  ;;  %2037 = vmatpush3.bf16.msra.mxu1 %v2296_v50 }
 0x3f5   : > { %v1017_v25 = vpack.c.bf16 %v1014_v22, %v1013_v21  ;;  %v1012_v26 = vadd.f32 %v1919_v4, %v1002_v23  ;;  %v1015_v10 = vmax.f32 %v1011_v24, 0.0  ;;  %v1928_v21 = vld [vmem:[%s3216_s0] ss:$0 sm:$0xff] }
 0x3f7   : > { %2134 = vmatprep.mubr.bf16.mxu0 %v1017_v25  ;;  %1372 = vmatprep.mubr.bf16.mxu1 %v1017_v25  ;;  %v1016_v27 = vmax.f32 %v1012_v26, 0.0  ;;  %v1929_v25 = vld [vmem:[%s3217_s12] ss:$0 sm:$0xff] }
 0x3f9   : > { %v3040_v28 = vpack.c.bf16 %v1016_v27, %v1015_v10 }
 0x3fb   : > { %2135 = vmatmul.mubr.bf16.vlgmr.msra.gmra.mrb[4].mxu0 %v3040_v28 }
 0x3fc   : > { %1629 = vmatprep.mubr.bf16.mxu0 %v3004_v15 }
 0x4ce   : > { %v3044_v20 = vpop.f32.mrb[4].mxu0 }
 0x4cf   : > { %v3046_v29 = vpop.f32.mrb[5].mxu0  ;;  %v1148_v15 = vmul.f32 %v3044_v20, %v3044_v20 }
 0x4d0   : > { %1134 = vadd.xlane.f32.xlu0 %v3046_v29  ;;  %v3049_v30 = vpop.f32.mrb[6].mxu0  ;;  %v1146_v32 = vmul.f32 %v3046_v29, %v3046_v29 }
 0x4d1   : > { %v3051_v31 = vpop.f32.mrb[7].mxu0  ;;  %v1149_v34 = vmul.f32 %v3049_v30, %v3049_v30 }
 0x4d2   : > { %1136 = vadd.xlane.f32.xlu1 %v3051_v31  ;;  %v1147_v33 = vmul.f32 %v3051_v31, %v3051_v31 }
 0x4d4   : > { %1150 = vadd.xlane.f32.xlu0 %v1146_v32 }
 0x4d6   : > { %1152 = vadd.xlane.f32.xlu1 %v1147_v33 }
 0x4d8   : > { %1138 = vadd.xlane.f32.xlu0 %v3044_v20 }
 0x4da   : > { %1140 = vadd.xlane.f32.xlu1 %v3049_v30 }
 0x4dc   : > { %1154 = vadd.xlane.f32.xlu0 %v1148_v15 }
 0x4de   : > { %1156 = vadd.xlane.f32.xlu1 %v1149_v34 }
 0x55d   : > { %v1135_v51 = vpop.xlane.xlu0 %1134 }
 0x55e   : > { %v1142_v52 = vmul.f32 0.0078125, %v1135_v51 }
 0x55f   : > { %v1137_v53 = vpop.xlane.xlu1 %1136 }
 0x560   : > { %v1143_v54 = vmul.f32 0.0078125, %v1137_v53  ;;  %v1162_v56 = vmul.f32 %v1142_v52, %v1142_v52  ;;  %v1170_v12 = vsub.f32 %v3046_v29, %v1142_v52 }
 0x561   : > { %v1151_v55 = vpop.xlane.xlu0 %1150 }
 0x562   : > { %v1158_v57 = vmul.f32 0.0078125, %v1151_v55  ;;  %v1163_v59 = vmul.f32 %v1143_v54, %v1143_v54  ;;  %v1171_v22 = vsub.f32 %v3051_v31, %v1143_v54 }
 0x563   : > { %v1153_v58 = vpop.xlane.xlu1 %1152 }
 0x564   : > { %v1166_v60 = vsub.f32 %v1158_v57, %v1162_v56  ;;  %v1159_v61 = vmul.f32 0.0078125, %v1153_v58 }
 0x565   : > { %v1139_v62 = vpop.xlane.xlu0 %1138 }
 0x566   : > { %v1174_v63 = vadd.f32 1e-05, %v1166_v60  ;;  %v1167_v0 = vsub.f32 %v1159_v61, %v1163_v59  ;;  %v1144_v1 = vmul.f32 0.0078125, %v1139_v62  ;;  %v2297_v59 = vld [vmem:[#allocation11 + $0x40] sm:$0xff]   ;;  %v2299_v61 = vld [vmem:[#allocation11 + $0x48] sm:$0xff]  }
 0x567   : > { %v1141_v2 = vpop.xlane.xlu1 %1140  ;;  %v2298_v60 = vld [vmem:[#allocation11] sm:$0xff]   ;;  %2050 = vmatprep.subr.bf16.mxu0 %v2297_v59  ;;  %2138 = vmatprep.subr.bf16.mxu1 %v2297_v59  ;;  %v2300_v62 = vld [vmem:[#allocation11 + $0x8] sm:$0xff]  }
 0x568   : > { %2329 = vrsqrt.f32 %v1174_v63  ;;  %v1175_v3 = vadd.f32 1e-05, %v1167_v0  ;;  %v1145_v4 = vmul.f32 0.0078125, %v1141_v2  ;;  %v1164_v6 = vmul.f32 %v1144_v1, %v1144_v1  ;;  %2051 = vmatpush3.bf16.msra.mxu0 %v2298_v60  ;;  %v2301_v63 = vld [vmem:[#allocation11 + $0x50] sm:$0xff]   ;;  %v2304_v2 = vld [vmem:[#allocation11 + $0x18] sm:$0xff]  }
 0x569   : > { %v1155_v5 = vpop.xlane.xlu0 %1154  ;;  %v1172_v29 = vsub.f32 %v3044_v20, %v1144_v1  ;;  %2052 = vmatprep.subr.bf16.mxu0 %v2299_v61  ;;  %v2302_v0 = vld [vmem:[#allocation11 + $0x10] sm:$0xff]   ;;  %v2303_v1 = vld [vmem:[#allocation11 + $0x58] sm:$0xff]  }
 0x56a   : > { %2331 = vrsqrt.f32 %v1175_v3  ;;  %v1160_v7 = vmul.f32 0.0078125, %v1155_v5  ;;  %v1165_v9 = vmul.f32 %v1145_v4, %v1145_v4  ;;  %v1173_v34 = vsub.f32 %v3049_v30, %v1145_v4  ;;  %v2305_v3 = vld [vmem:[#allocation11 + $0x60] sm:$0xff]   ;;  %v2307_v5 = vld [vmem:[#allocation11 + $0x68] sm:$0xff]  }
 0x56b   : > { %v1157_v8 = vpop.xlane.xlu1 %1156  ;;  %v2306_v4 = vld [vmem:[#allocation11 + $0x20] sm:$0xff]  }
 0x56c   : > { %v1168_v11 = vsub.f32 %v1160_v7, %v1164_v6  ;;  %v1161_v13 = vmul.f32 0.0078125, %v1157_v8  ;;  %2053 = vmatpush3.bf16.msra.mxu0 %v2300_v62  ;;  %v2308_v6 = vld [vmem:[#allocation11 + $0x28] sm:$0xff]   ;;  %v2309_v7 = vld [vmem:[#allocation11 + $0x70] sm:$0xff]  }
 0x56d   : > { %2054 = vmatprep.subr.bf16.mxu0 %v2301_v63  ;;  %v2310_v8 = vld [vmem:[#allocation11 + $0x30] sm:$0xff]  }
 0x56e   : > { %v1176_v14 = vadd.f32 1e-05, %v1168_v11  ;;  %v1169_v16 = vsub.f32 %v1161_v13, %v1165_v9  ;;  %v2311_v9 = vld [vmem:[#allocation11 + $0x78] sm:$0xff]  }
 0x56f   : > { %v2312_v11 = vld [vmem:[#allocation11 + $0x38] sm:$0xff]  }
 0x570   : > { %2333 = vrsqrt.f32 %v1176_v14  ;;  %v1177_v17 = vadd.f32 1e-05, %v1169_v16  ;;  %2055 = vmatpush3.bf16.msra.mxu0 %v2302_v0 }
 0x571   : > { %2056 = vmatprep.subr.bf16.mxu0 %v2303_v1 }
 0x572   : > { %v2330_v19 = vpop.eup %2329  ;;  %2335 = vrsqrt.f32 %v1177_v17 }
 0x573   : > { %v1182_v23 = vmul.f32 %v2330_v19, %v1170_v12 }
 0x574   : > { %v2332_v24 = vpop.eup %2331  ;;  %2057 = vmatpush3.bf16.msra.mxu0 %v2304_v2 }
 0x575   : > { %v1183_v26 = vmul.f32 %v2332_v24, %v1171_v22  ;;  %v1192_v10 = vmul.f32 %v1928_v21, %v1182_v23  ;;  %2058 = vmatprep.subr.bf16.mxu0 %v2305_v3 }
 0x577   : > { %v1193_v27 = vmul.f32 %v1928_v21, %v1183_v26  ;;  %v1202_v32 = vadd.f32 %v1929_v25, %v1192_v10 }
 0x578   : > { %2059 = vmatpush3.bf16.msra.mxu0 %v2306_v4 }
 0x579   : > { %v1203_v33 = vadd.f32 %v1929_v25, %v1193_v27  ;;  %v1206_v35 = vmax.f32 %v1202_v32, 0.0  ;;  %2060 = vmatprep.subr.bf16.mxu0 %v2307_v5 }
 0x57a   : > { %v2334_v15 = vpop.eup %2333 }
 0x57b   : > { %v1207_v36 = vmax.f32 %v1203_v33, 0.0  ;;  %v1184_v37 = vmul.f32 %v2334_v15, %v1172_v29 }
 0x57c   : > { %v2336_v31 = vpop.eup %2335  ;;  %2061 = vmatpush3.bf16.msra.mxu0 %v2308_v6 }
 0x57d   : > { %v1210_v38 = vpack.c.bf16 %v1207_v36, %v1206_v35  ;;  %v1185_v39 = vmul.f32 %v2336_v31, %v1173_v34  ;;  %v1194_v40 = vmul.f32 %v1928_v21, %v1184_v37  ;;  %2062 = vmatprep.subr.bf16.mxu0 %v2309_v7 }
 0x57f   : > { %1373 = vmatmul.mubr.bf16.vlgmr.msra.gmra.mrb[4].mxu1 %v1210_v38  ;;  %v1195_v41 = vmul.f32 %v1928_v21, %v1185_v39  ;;  %v1204_v42 = vadd.f32 %v1929_v25, %v1194_v40 }
 0x580   : > { %1380 = vmatprep.mubr.bf16.mxu1 %v3040_v28  ;;  %2146 = vmatpush3.bf16.msra.mxu1 %v2298_v60 }
 0x581   : > { %v1205_v43 = vadd.f32 %v1929_v25, %v1195_v41  ;;  %v1208_v44 = vmax.f32 %v1204_v42, 0.0  ;;  %2139 = vmatprep.subr.bf16.mxu1 %v2299_v61  ;;  %2063 = vmatpush3.bf16.msra.mxu0 %v2310_v8 }
 0x582   : > { %2064 = vmatprep.subr.bf16.mxu0 %v2311_v9 }
 0x583   : > { %v1209_v45 = vmax.f32 %v1205_v43, 0.0 }
 0x584   : > { %2147 = vmatpush3.bf16.msra.mxu1 %v2300_v62 }
 0x585   : > { %v1211_v20 = vpack.c.bf16 %v1209_v45, %v1208_v44  ;;  %2140 = vmatprep.subr.bf16.mxu1 %v2301_v63  ;;  %2065 = vmatpush3.bf16.msra.mxu0 %v2312_v11  ;;  %v1946_v45 = vld [vmem:[%s3218_s15] ss:$0 sm:$0xff]  ;;  %s1980_s15 = sshll.u32 %s2720_s27, 8  ;;  %s2611_s27 = smov [#allocation13]  }
 0x586   : > { %s3118_s0 = scalar_lea.hbm %s3222_s17, %s1980_s15  ;;  %s2527_s16 = sshll.u32 %s2611_s27, 4  ;;  %s2528_s16 = int_to_ptr.vmem [resolvable:$false] %s2527_s16 }
 0x587   : > { %1381 = vmatmul.mubr.bf16.gmra.mrb[8].mxu1 %v1211_v20  ;;  %s2529_s12 = scalar_lea.vmem %s2528_s16, 512  ;;  %p2530_p13 = scmp.lt.s32.totalorder %s3120_s26, %s2528_s16 }
 0x588   : > { %1637 = vmatprep.mubr.bf16.mxu1 %v3007_v18  ;;  %2148 = vmatpush3.bf16.msra.mxu1 %v2302_v0  ;;  %p2531_p0 = scmp.lt.s32.totalorder %s2529_s12, %s2523_s20 }
 0x589   : > { %2141 = vmatprep.subr.bf16.mxu1 %v2303_v1 }
 0x58a   : > { %p2532_p2 = por %p2531_p0, %p2530_p13 }
 0x58c   : > { %2149 = vmatpush3.bf16.msra.mxu1 %v2304_v2  ;;  %p2533_p8 = pnand %p2532_p2, %p2526_p1 }
 0x58d   : > { %2142 = vmatprep.subr.bf16.mxu1 %v2305_v3 }
 0x590   : > { %2150 = vmatpush3.bf16.msra.mxu1 %v2306_v4 }
 0x591   : > { %2143 = vmatprep.subr.bf16.mxu1 %v2307_v5 }
 0x594   : > { %2151 = vmatpush3.bf16.msra.mxu1 %v2308_v6 }
 0x595   : > { %2144 = vmatprep.subr.bf16.mxu1 %v2309_v7 }
 0x598   : > { %2152 = vmatpush3.bf16.msra.mxu1 %v2310_v8 }
 0x599   : > { %2145 = vmatprep.subr.bf16.mxu1 %v2311_v9 }
 0x59c   : > { %2153 = vmatpush3.bf16.msra.mxu1 %v2312_v11 }
 0x652   : > { %v2038_v30 = vpop.f32.mrb[4].mxu1 }
 0x653   : > { %v2039_v46 = vpop.f32.mrb[5].mxu1 }
 0x654   : > { %v3076_v47 = vadd.f32 %v2039_v46, %v2038_v30  ;;  %v2041_v48 = vpop.f32.mrb[6].mxu1 }
 0x655   : > { %v2042_v49 = vpop.f32.mrb[7].mxu1 }
 0x656   : > { %v3078_v50 = vadd.f32 %v2042_v49, %v2041_v48  ;;  %1391 = vadd.xlane.f32.xlu0 %v3076_v47  ;;  %v1403_v28 = vmul.f32 %v3076_v47, %v3076_v47  ;;  %v1947_v48 = vld [vmem:[%s3219_s30] ss:$0 sm:$0xff] }
 0x658   : > { %1393 = vadd.xlane.f32.xlu1 %v3078_v50  ;;  %v1404_v18 = vmul.f32 %v3078_v50, %v3078_v50 }
 0x65a   : > { %1407 = vadd.xlane.f32.xlu0 %v1403_v28  ;;  %v2044_v51 = vpop.f32.mrb[8].mxu1 }
 0x65b   : > { %v2045_v52 = vpop.f32.mrb[9].mxu1 }
 0x65c   : > { %v3086_v53 = vadd.f32 %v2045_v52, %v2044_v51  ;;  %1409 = vadd.xlane.f32.xlu1 %v1404_v18  ;;  %v2047_v54 = vpop.f32.mrb[10].mxu1 }
 0x65d   : > { %v2048_v55 = vpop.f32.mrb[11].mxu1 }
 0x65e   : > { %v3088_v56 = vadd.f32 %v2048_v55, %v2047_v54  ;;  %1395 = vadd.xlane.f32.xlu0 %v3086_v53  ;;  %v1405_v57 = vmul.f32 %v3086_v53, %v3086_v53 }
 0x660   : > { %1397 = vadd.xlane.f32.xlu1 %v3088_v56  ;;  %v1406_v58 = vmul.f32 %v3088_v56, %v3088_v56 }
 0x662   : > { %1411 = vadd.xlane.f32.xlu0 %v1405_v57 }
 0x664   : > { %1413 = vadd.xlane.f32.xlu1 %v1406_v58 }
 0x6e3   : > { %v1392_v13 = vpop.xlane.xlu0 %1391 }
 0x6e4   : > { %v1399_v14 = vmul.f32 0.0078125, %v1392_v13 }
 0x6e5   : > { %v1394_v16 = vpop.xlane.xlu1 %1393 }
 0x6e6   : > { %v1400_v17 = vmul.f32 0.0078125, %v1394_v16  ;;  %v1419_v19 = vmul.f32 %v1399_v14, %v1399_v14  ;;  %v1427_v43 = vsub.f32 %v3076_v47, %v1399_v14 }
 0x6e7   : > { %v1408_v12 = vpop.xlane.xlu0 %1407 }
 0x6e8   : > { %v1415_v21 = vmul.f32 0.0078125, %v1408_v12  ;;  %v1420_v23 = vmul.f32 %v1400_v17, %v1400_v17  ;;  %v1428_v20 = vsub.f32 %v3078_v50, %v1400_v17 }
 0x6e9   : > { %v1410_v22 = vpop.xlane.xlu1 %1409 }
 0x6ea   : > { %v1423_v24 = vsub.f32 %v1415_v21, %v1419_v19  ;;  %v1416_v25 = vmul.f32 0.0078125, %v1410_v22 }
 0x6eb   : > { %v1396_v26 = vpop.xlane.xlu0 %1395 }
 0x6ec   : > { %v1431_v10 = vadd.f32 1e-05, %v1423_v24  ;;  %v1424_v27 = vsub.f32 %v1416_v25, %v1420_v23  ;;  %v1401_v32 = vmul.f32 0.0078125, %v1396_v26 }
 0x6ed   : > { %v1398_v29 = vpop.xlane.xlu1 %1397 }
 0x6ee   : > { %2337 = vrsqrt.f32 %v1431_v10  ;;  %v1432_v33 = vadd.f32 1e-05, %v1424_v27  ;;  %v1402_v15 = vmul.f32 0.0078125, %v1398_v29  ;;  %v1421_v35 = vmul.f32 %v1401_v32, %v1401_v32 }
 0x6ef   : > { %v1412_v34 = vpop.xlane.xlu0 %1411  ;;  %v1429_v47 = vsub.f32 %v3086_v53, %v1401_v32 }
 0x6f0   : > { %2339 = vrsqrt.f32 %v1432_v33  ;;  %v1417_v36 = vmul.f32 0.0078125, %v1412_v34  ;;  %v1422_v31 = vmul.f32 %v1402_v15, %v1402_v15  ;;  %v1430_v55 = vsub.f32 %v3088_v56, %v1402_v15 }
 0x6f1   : > { %v1414_v37 = vpop.xlane.xlu1 %1413 }
 0x6f2   : > { %v1425_v38 = vsub.f32 %v1417_v36, %v1421_v35  ;;  %v1418_v39 = vmul.f32 0.0078125, %v1414_v37 }
 0x6f4   : > { %v1433_v40 = vadd.f32 1e-05, %v1425_v38  ;;  %v1426_v41 = vsub.f32 %v1418_v39, %v1422_v31 }
 0x6f6   : > { %2341 = vrsqrt.f32 %v1433_v40  ;;  %v1434_v42 = vadd.f32 1e-05, %v1426_v41 }
 0x6f8   : > { %v2338_v44 = vpop.eup %2337  ;;  %2343 = vrsqrt.f32 %v1434_v42 }
 0x6f9   : > { %v1439_v30 = vmul.f32 %v2338_v44, %v1427_v43 }
 0x6fa   : > { %v2340_v46 = vpop.eup %2339 }
 0x6fb   : > { %v1440_v49 = vmul.f32 %v2340_v46, %v1428_v20  ;;  %v1449_v28 = vmul.f32 %v1946_v45, %v1439_v30 }
 0x6fd   : > { %v1450_v51 = vmul.f32 %v1946_v45, %v1440_v49  ;;  %v1459_v18 = vadd.f32 %v1947_v48, %v1449_v28 }
 0x6ff   : > { %v1460_v52 = vadd.f32 %v1947_v48, %v1450_v51  ;;  %v1463_v58 = vmax.f32 %v1459_v18, 0.0  ;;  %v1964_v18 = vld [vmem:[%s3220_s28] ss:$0 sm:$0xff]  ;;  %s1745_s28 = scalar_lea.sflag [#allocation4], %s2948_s1 }
 0x700   : > { %v2342_v54 = vpop.eup %2341 }
 0x701   : > { %v1441_v57 = vmul.f32 %v2342_v54, %v1429_v47  ;;  %v1464_v59 = vmax.f32 %v1460_v52, 0.0 }
 0x702   : > { %v2344_v50 = vpop.eup %2343 }
 0x703   : > { %v1442_v60 = vmul.f32 %v2344_v50, %v1430_v55  ;;  %v1467_v61 = vpack.c.bf16 %v1464_v59, %v1463_v58  ;;  %v1451_v62 = vmul.f32 %v1946_v45, %v1441_v57  ;;  %v1965_v55 = vld [vmem:[%s3221_s18] ss:$0 sm:$0xff] }
 0x705   : > { %1630 = vmatmul.mubr.bf16.vlgmr.msra.gmra.mrb[8].mxu0 %v1467_v61  ;;  %v1452_v63 = vmul.f32 %v1946_v45, %v1442_v60  ;;  %v1461_v0 = vadd.f32 %v1947_v48, %v1451_v62 }
 0x707   : > { %v1462_v1 = vadd.f32 %v1947_v48, %v1452_v63  ;;  %v1465_v2 = vmax.f32 %v1461_v0, 0.0 }
 0x709   : > { %v1466_v3 = vmax.f32 %v1462_v1, 0.0 }
 0x70b   : > { %v1468_v4 = vpack.c.bf16 %v1466_v3, %v1465_v2 }
 0x70d   : > { %1638 = vmatmul.mubr.bf16.vlgmr.msra.gmra.mrb[12].mxu1 %v1468_v4 }
 0x7d8   : > { %v2066_v53 = vpop.f32.mrb[8].mxu0 }
 0x7d9   : > { %v2067_v5 = vpop.f32.mrb[9].mxu0 }
 0x7da   : > { %v2068_v6 = vadd.f32 %v2067_v5, %v2066_v53  ;;  %v2069_v7 = vpop.f32.mrb[10].mxu0 }
 0x7db   : > { %v2070_v56 = vpop.f32.mrb[11].mxu0 }
 0x7dc   : > { %v2071_v8 = vadd.f32 %v2070_v56, %v2069_v7  ;;  %1648 = vadd.xlane.f32.xlu0 %v2068_v6  ;;  %v1660_v9 = vmul.f32 %v2068_v6, %v2068_v6 }
 0x7de   : > { %1650 = vadd.xlane.f32.xlu1 %v2071_v8  ;;  %v1661_v13 = vmul.f32 %v2071_v8, %v2071_v8 }
 0x7e0   : > { %1664 = vadd.xlane.f32.xlu0 %v1660_v9  ;;  %v2072_v11 = vpop.f32.mrb[12].mxu1 }
 0x7e1   : > { %v2073_v14 = vpop.f32.mrb[13].mxu1 }
 0x7e2   : > { %v2074_v16 = vadd.f32 %v2073_v14, %v2072_v11  ;;  %1666 = vadd.xlane.f32.xlu1 %v1661_v13  ;;  %v2075_v17 = vpop.f32.mrb[14].mxu1 }
 0x7e3   : > { %v2076_v12 = vpop.f32.mrb[15].mxu1 }
 0x7e4   : > { %v2077_v19 = vadd.f32 %v2076_v12, %v2075_v17  ;;  %1652 = vadd.xlane.f32.xlu0 %v2074_v16  ;;  %v1662_v21 = vmul.f32 %v2074_v16, %v2074_v16 }
 0x7e6   : > { %1654 = vadd.xlane.f32.xlu1 %v2077_v19  ;;  %v1663_v22 = vmul.f32 %v2077_v19, %v2077_v19 }
 0x7e8   : > { %1668 = vadd.xlane.f32.xlu0 %v1662_v21 }
 0x7ea   : > { %1670 = vadd.xlane.f32.xlu1 %v1663_v22 }
 0x869   : > { %v1649_v23 = vpop.xlane.xlu0 %1648 }
 0x86a   : > { %v1656_v24 = vmul.f32 0.0078125, %v1649_v23 }
 0x86b   : > { %v1651_v25 = vpop.xlane.xlu1 %1650 }
 0x86c   : > { %v1657_v26 = vmul.f32 0.0078125, %v1651_v25  ;;  %v1676_v27 = vmul.f32 %v1656_v24, %v1656_v24  ;;  %v1684_v28 = vsub.f32 %v2068_v6, %v1656_v24 }
 0x86d   : > { %v1665_v10 = vpop.xlane.xlu0 %1664 }
 0x86e   : > { %v1672_v32 = vmul.f32 0.0078125, %v1665_v10  ;;  %v1677_v33 = vmul.f32 %v1657_v26, %v1657_v26  ;;  %v1685_v47 = vsub.f32 %v2071_v8, %v1657_v26 }
 0x86f   : > { %v1667_v29 = vpop.xlane.xlu1 %1666 }
 0x870   : > { %v1680_v15 = vsub.f32 %v1672_v32, %v1676_v27  ;;  %v1673_v34 = vmul.f32 0.0078125, %v1667_v29 }
 0x871   : > { %v1653_v35 = vpop.xlane.xlu0 %1652 }
 0x872   : > { %v1688_v36 = vadd.f32 1e-05, %v1680_v15  ;;  %v1681_v37 = vsub.f32 %v1673_v34, %v1677_v33  ;;  %v1658_v31 = vmul.f32 0.0078125, %v1653_v35 }
 0x873   : > { %v1655_v38 = vpop.xlane.xlu1 %1654 }
 0x874   : > { %2345 = vrsqrt.f32 %v1688_v36  ;;  %v1689_v39 = vadd.f32 1e-05, %v1681_v37  ;;  %v1659_v40 = vmul.f32 0.0078125, %v1655_v38  ;;  %v1678_v42 = vmul.f32 %v1658_v31, %v1658_v31 }
 0x875   : > { %v1669_v41 = vpop.xlane.xlu0 %1668  ;;  %v1686_v61 = vsub.f32 %v2074_v16, %v1658_v31 }
 0x876   : > { %2347 = vrsqrt.f32 %v1689_v39  ;;  %v1674_v43 = vmul.f32 0.0078125, %v1669_v41  ;;  %v1679_v45 = vmul.f32 %v1659_v40, %v1659_v40  ;;  %v1687_v1 = vsub.f32 %v2077_v19, %v1659_v40 }
 0x877   : > { %v1671_v44 = vpop.xlane.xlu1 %1670 }
 0x878   : > { %v1682_v20 = vsub.f32 %v1674_v43, %v1678_v42  ;;  %v1675_v30 = vmul.f32 0.0078125, %v1671_v44 }
 0x87a   : > { %v1690_v46 = vadd.f32 1e-05, %v1682_v20  ;;  %v1683_v48 = vsub.f32 %v1675_v30, %v1679_v45 }
 0x87c   : > { %2349 = vrsqrt.f32 %v1690_v46  ;;  %v1691_v49 = vadd.f32 1e-05, %v1683_v48 }
 0x87e   : > { %v2346_v51 = vpop.eup %2345  ;;  %2351 = vrsqrt.f32 %v1691_v49 }
 0x87f   : > { %v1696_v52 = vmul.f32 %v2346_v51, %v1684_v28 }
 0x880   : > { %v2348_v54 = vpop.eup %2347 }
 0x881   : > { %v1706_v57 = vmul.f32 %v1964_v18, %v1696_v52  ;;  %v1697_v58 = vmul.f32 %v2348_v54, %v1685_v47 }
 0x883   : > { %v1716_v59 = vadd.f32 %v1965_v55, %v1706_v57  ;;  %v1707_v50 = vmul.f32 %v1964_v18, %v1697_v58 }
 0x885   : > { %v1717_v60 = vadd.f32 %v1965_v55, %v1707_v50  ;;  %v1720_v63 = vmax.f32 %v1716_v59, 0.0 }
 0x886   : > { %v2350_v62 = vpop.eup %2349 }
 0x887   : > { %v1721_v0 = vmax.f32 %v1717_v60, 0.0  ;;  %v1698_v2 = vmul.f32 %v2350_v62, %v1686_v61 }
 0x888   : > { %v2352_v3 = vpop.eup %2351 }
 0x889   : > { %v1708_v4 = vmul.f32 %v1964_v18, %v1698_v2  ;;  %v1699_v53 = vmul.f32 %v2352_v3, %v1687_v1  ;;  %v1984_v5 = vpack.c.bf16 %v1721_v0, %v1720_v63 }
 0x88b   : > { %v1718_v6 = vadd.f32 %v1965_v55, %v1708_v4  ;;  %v1709_v7 = vmul.f32 %v1964_v18, %v1699_v53  ;;  %1985 = vst [vmem:[%s612_s8] sm:$0xff] %v1984_v5  }
 0x88d   : > { %v1719_v56 = vadd.f32 %v1965_v55, %v1709_v7  ;;  %v1722_v8 = vmax.f32 %v1718_v6, 0.0 }
 0x88f   : > { %v1723_v9 = vmax.f32 %v1719_v56, 0.0 }
 0x891   : > { %v1989_v11 = vpack.c.bf16 %v1723_v9, %v1722_v8 }
 0x893   : > { %1991 = vst [vmem:[%s612_s8 + $0x8] sm:$0xff] %v1989_v11  }
 0x894   : > { %2536 = shalt.err (!%p2533_p8)
}
 0x895   : > { %s2537_s18 = scalar_lea.hbm %s3118_s0, 256  ;;  %s2541_s14 = scalar_lea.hbm %s3222_s17, 512 }
 0x896   : > { %p2538_p6 = scmp.ne.s32.totalorder %s3118_s0, %s2537_s18  ;;  %p2542_p3 = scmp.lt.u32.totalorder %s3118_s0, %s3222_s17 }
 0x897   : > { %p2543_p5 = scmp.lt.u32.totalorder %s2541_s14, %s2537_s18  ;;  %p2545_p7 = scmp.lt.u32.totalorder %s2537_s18, %s3118_s0 }
 0x898   : > { %p2539_p10 = pnand %p2538_p6, %p3223_p4 }
 0x899   : > { %p2544_p9 = por %p2543_p5, %p2542_p3 }
 0x89a   : > { %p2540_p11 = pneg %p2539_p10 }
 0x89b   : > { %p2546_p12 = por %p2545_p7, %p2544_p9 }
 0x89d   : > { %p2547_p1 = pnand %p2546_p12, %p2540_p11 }
 0x89f   : > { %2550 = shalt.err (!%p2547_p1)
}
 0x8a0   : > { %s2612_s20 = smov 64   ;;  %s2613_s16 = smov 4  }
 0x8a1   : > { %2176 = dma.vmem_to_hbm [thread:$0]  (%p3223_p4), %s3120_s26, 256, %s3118_s0, %s1745_s28, %s2612_s20, %s2612_s20, %s2613_s16  }
 0x8a2 PF: > { %s1773_s12 = sand.u32 1, %s2589_s21   ;;  %p3224_p13 = scmp.ne.s32.totalorder %s3204_s25, 0 }
 0x8a3   : > { %p3225_p0 = scmp.ge.s32.totalorder %s2601_s24, 2  ;;  %s1774_s18 = scalar_lea.sflag [#allocation4], %s1773_s12 }
 0x8a5   : > { %p2199_p2 = pnand %p3225_p0, %p3224_p13 }
 0x8a7   : > { %2584 = dma.done.wait (!%p2199_p2), %s1774_s18, 256  }
 0x8a8   : > { %2586 = vsyncadd (!%p2199_p2), %s1774_s18, 4294967040  ;;  %p32_p8 = scmp.ge.s32.totalorder %s2872_s29, 4   ;;  %s3226_s21 = smov %s2593_s22 }
 0x8a9   : > { %s3227_s22 = smov %s2597_s23  ;;  %s3228_s23 = smov %s2884_s9 }
 0x8aa   : > { %s3229_s24 = smov %s2872_s29  ;;  %34 = sbr.rel (!%p32_p8) target bundleno = 18 (0x12), region = 149 }
 0x8b1   :  { %1779 = vsyncpa [#allocation3], 1 }
 0x8b2   :  { %1781 = vsyncpa [#allocation3 + $0x1], 1 }
 0x8b3   :  { %1782 = vsyncpa [#allocation6], 1 }
 0x8b4   :  { %1783 = vsyncpa [#allocation9], 1 }
 0x8b5   :  { %1784 = vsyncpa [#allocation12], 1 }
 0x8b6   :  { %1785 = vsyncpa [#allocation4], 1 }
 0x8b7   :  { %1787 = vsyncpa [#allocation4 + $0x1], 1 }

</bundles_post_ra>
